<compile_context>
chip_gen: v7x
topology: tpu7x:2x2x1
jax: 0.10.0
libtpu: 0.0.40
codegen_flags: <defaults>
</compile_context>

<pallas_src>
import functools
import math

import jax
import jax.numpy as jnp
from jax.experimental import pallas as pl
from jax.experimental.pallas import tpu as pltpu


_EPS = 0.1            # Dist2LogitLayer.forward default eps
_NEG_SLOPE = 0.2      # LeakyReLU(0.2)
_LOG_CLAMP = -100.0   # torch.nn.BCELoss clamps log terms at -100
_LANE_TILE = 1024     # lane tile (multiple of 128), f32 -> 4 KiB per input row


def _bce_ranking_kernel(d0_ref, d1_ref, judge_ref,
                        w1_ref, b1_ref, w2_ref, b2_ref, w3_ref, b3_ref,
                        loss_ref, logit_ref, *, n_valid):
    """One lane-dense tile of pixels; accumulates the BCE sum into loss_ref."""
    i = pl.program_id(0)
    tp = d0_ref.shape[-1]

    @pl.when(i == 0)
    def _init():
        loss_ref[...] = jnp.zeros_like(loss_ref)

    a = d0_ref[0]        # (1, TP)
    b = d1_ref[0]        # (1, TP)
    jd = judge_ref[0]    # (1, TP)

    r0 = a / (b + _EPS)
    r1 = b / (a + _EPS)

    # Layer 1: 1x1 conv 5 -> chn_mid, expressed as 5 broadcast MACs (VPU).
    w1 = w1_ref[...]                                   # (chn, 5)
    h = (w1[:, 0:1] * a + w1[:, 1:2] * b + w1[:, 2:3] * (a - b)
         + w1[:, 3:4] * r0 + w1[:, 4:5] * r1 + b1_ref[...])   # (chn, TP)
    h = jnp.where(h > 0, h, _NEG_SLOPE * h)

    # Layer 2: 1x1 conv chn -> chn == dense matmul on the MXU.
    h = jnp.dot(w2_ref[...], h, preferred_element_type=jnp.float32) + b2_ref[...]
    h = jnp.where(h > 0, h, _NEG_SLOPE * h)

    # Layer 3: chn -> 1 (multiply + sublane reduce), then sigmoid (EUP).
    z = jnp.sum(h * w3_ref[...], axis=0, keepdims=True) + b3_ref[...]   # (1, TP)
    p = 1.0 / (1.0 + jnp.exp(-z))

    logit_ref[...] = p[None]                            # (1, 1, TP), lane-dense store

    # BCE vs per = (judge+1)/2, with torch-style log clamping at -100.
    per = (jd + 1.0) * 0.5
    log_p = jnp.maximum(jnp.log(p), _LOG_CLAMP)
    log_1mp = jnp.maximum(jnp.log(1.0 - p), _LOG_CLAMP)
    bce = -(per * log_p + (1.0 - per) * log_1mp)        # (1, TP)

    # Mask out the padded tail of the last tile.
    lane = jax.lax.broadcasted_iota(jnp.int32, (1, tp), 1)
    valid = (i * tp + lane) < n_valid
    loss_ref[...] += jnp.sum(jnp.where(valid, bce, 0.0), keepdims=True)

    @pl.when(i == pl.num_programs(0) - 1)
    def _finalize():
        loss_ref[...] = loss_ref[...] * (1.0 / float(n_valid))   # mean reduction


def bce_ranking_loss(d0, d1, judge, params, *, lane_tile=_LANE_TILE):
    """Fused BCERankingLoss forward. Returns (scalar loss, logit map)."""
    w1, b1, w2, b2, w3, b3 = params
    chn = w1.shape[0]
    assert d0.shape == d1.shape == judge.shape, "d0/d1/judge must share a shape"
    assert lane_tile % 128 == 0

    orig_shape = d0.shape
    n = int(d0.size)
    tp = int(lane_tile)
    t = int(pl.cdiv(n, tp))
    n_pad = t * tp

    def prep(x, pad_value):
        xf = jnp.ravel(x).astype(jnp.float32)
        if n_pad > n:
            xf = jnp.pad(xf, (0, n_pad - n), constant_values=pad_value)
        return xf.reshape(t, 1, tp)

    d0p = prep(d0, 1.0)     # pad with 1.0 -> finite features in the padded tail
    d1p = prep(d1, 1.0)
    jdp = prep(judge, 0.0)

    w1r = w1.astype(jnp.float32).reshape(chn, 5)
    b1r = b1.astype(jnp.float32).reshape(chn, 1)
    w2r = w2.astype(jnp.float32).reshape(chn, chn)
    b2r = b2.astype(jnp.float32).reshape(chn, 1)
    w3r = w3.astype(jnp.float32).reshape(chn, 1)   # (1, chn) -> column vector
    b3r = b3.astype(jnp.float32).reshape(1, 1)

    tile_spec = pl.BlockSpec((1, 1, tp), lambda i: (i, 0, 0))
    grid_spec = pltpu.PrefetchScalarGridSpec(
        num_scalar_prefetch=0,
        grid=(t,),
        in_specs=[
            tile_spec,                                          # d0
            pl.BlockSpec((1, 1, tp), lambda i: (i, 0, 0)),      # d1
            pl.BlockSpec((1, 1, tp), lambda i: (i, 0, 0)),      # judge
            pl.BlockSpec((chn, 5), lambda i: (0, 0)),           # w1
            pl.BlockSpec((chn, 1), lambda i: (0, 0)),           # b1
            pl.BlockSpec((chn, chn), lambda i: (0, 0)),         # w2
            pl.BlockSpec((chn, 1), lambda i: (0, 0)),           # b2
            pl.BlockSpec((chn, 1), lambda i: (0, 0)),           # w3
            pl.BlockSpec((1, 1), lambda i: (0, 0)),             # b3
        ],
        out_specs=(
            pl.BlockSpec((1, 1), lambda i: (0, 0)),             # loss accumulator
            pl.BlockSpec((1, 1, tp), lambda i: (i, 0, 0)),      # logit tiles
        ),
    )

    loss2d, logit_pad = pl.pallas_call(
        functools.partial(_bce_ranking_kernel, n_valid=n),
        grid_spec=grid_spec,
        out_shape=(
            jax.ShapeDtypeStruct((1, 1), jnp.float32),
            jax.ShapeDtypeStruct((t, 1, tp), jnp.float32),
        ),
        compiler_params=pltpu.CompilerParams(
            # reduction axis (resident accumulator) -> must be "arbitrary"
            dimension_semantics=("arbitrary",),
            vmem_limit_bytes=32 * 1024 * 1024,
        ),
    )(d0p, d1p, jdp, w1r, b1r, w2r, b2r, w3r, b3r)

    loss = loss2d[0, 0]
    logit = logit_pad.reshape(-1)[:n].reshape(orig_shape)
    return loss, logit


def init_bce_ranking_params(key, chn_mid=32):
    """Deterministic init mirroring PyTorch Conv2d defaults (uniform +-1/sqrt(fan_in))."""
    ks = jax.random.split(key, 6)

    def unif(k, shape, fan_in):
        bound = 1.0 / math.sqrt(fan_in)
        return jax.random.uniform(k, shape, jnp.float32, -bound, bound)

    w1 = unif(ks[0], (chn_mid, 5), 5)
    b1 = unif(ks[1], (chn_mid,), 5)
    w2 = unif(ks[2], (chn_mid, chn_mid), chn_mid)
    b2 = unif(ks[3], (chn_mid,), chn_mid)
    w3 = unif(ks[4], (1, chn_mid), chn_mid)
    b3 = unif(ks[5], (1,), chn_mid)
    return (w1, b1, w2, b2, w3, b3)


class BCERankingLoss:
    """JAX/Pallas port of lpips.BCERankingLoss (forward pass)."""

    def __init__(self, chn_mid=32, key=None, lane_tile=_LANE_TILE):
        if key is None:
            key = jax.random.PRNGKey(0)
        self.chn_mid = chn_mid
        self.lane_tile = lane_tile
        self.params = init_bce_ranking_params(key, chn_mid)
        self.logit = None
        # TODO(synk): autograd backward / parameter updates are not implemented
        # (forward loss only, matching the requested forward semantics).

    def forward(self, d0, d1, judge):
        loss, logit = bce_ranking_loss(d0, d1, judge, self.params,
                                       lane_tile=self.lane_tile)
        self.logit = logit      # parity with reference: self.logit = self.net(d0, d1)
        return loss

    __call__ = forward


def _reference_forward(d0, d1, judge, params):
    """Pure-JAX reference of the PyTorch module (NCHW 1x1 convs)."""
    w1, b1, w2, b2, w3, b3 = params
    hp = jax.lax.Precision.HIGHEST
    f = jnp.concatenate(
        [d0, d1, d0 - d1, d0 / (d1 + _EPS), d1 / (d0 + _EPS)], axis=1)
    h = jnp.einsum('nchw,oc->nohw', f, w1, precision=hp) + b1.reshape(1, -1, 1, 1)
    h = jnp.where(h > 0, h, _NEG_SLOPE * h)
    h = jnp.einsum('nchw,oc->nohw', h, w2, precision=hp) + b2.reshape(1, -1, 1, 1)
    h = jnp.where(h > 0, h, _NEG_SLOPE * h)
    z = jnp.einsum('nchw,oc->nohw', h, w3, precision=hp) + b3.reshape(1, -1, 1, 1)
    p = jax.nn.sigmoid(z)
    per = (judge + 1.0) / 2.0
    log_p = jnp.maximum(jnp.log(p), _LOG_CLAMP)
    log_1mp = jnp.maximum(jnp.log(1.0 - p), _LOG_CLAMP)
    loss = jnp.mean(-(per * log_p + (1.0 - per) * log_1mp))
    return loss, p


if __name__ == "__main__":
    key = jax.random.PRNGKey(0)
    k0, k1, k2, kw = jax.random.split(key, 4)

    # (N, 1, H, W) distance maps + per-pixel judgement, as Dist2LogitLayer expects.
    shape = (2, 1, 16, 16)
    d0 = jax.random.uniform(k0, shape, jnp.float32)                  # distances >= 0
    d1 = jax.random.uniform(k1, shape, jnp.float32)
    judge = jax.random.uniform(k2, shape, jnp.float32, -1.0, 1.0)    # in [-1, 1]

    model = BCERankingLoss(chn_mid=32, key=kw)
    loss = model.forward(d0, d1, judge)
    loss = jax.block_until_ready(loss)

    ref_loss, ref_logit = _reference_forward(d0, d1, judge, model.params)
    ref_loss = jax.block_until_ready(ref_loss)

    assert bool(jnp.isfinite(loss))
    assert model.logit.shape == shape and model.logit.dtype == jnp.float32
    assert abs(float(loss) - float(ref_loss)) < 5e-3, (float(loss), float(ref_loss))
    assert float(jnp.max(jnp.abs(model.logit - ref_logit))) < 1e-2

    # Extra check: multi-tile grid path (accumulation across grid steps).
    loss_mt, _ = bce_ranking_loss(d0, d1, judge, model.params, lane_tile=128)
    loss_mt = jax.block_until_ready(loss_mt)
    assert abs(float(loss_mt) - float(ref_loss)) < 5e-3, (float(loss_mt), float(ref_loss))

    print("KERNEL_OK")
</pallas_src>

<mosaic_0001>
module attributes {stable_mosaic.version = 11 : i64} {
  func.func @_bce_ranking_kernel(%arg0: i32, %arg1: memref<1x1x1024xf32, #tpu.memory_space<vmem>>, %arg2: memref<1x1x1024xf32, #tpu.memory_space<vmem>>, %arg3: memref<1x1x1024xf32, #tpu.memory_space<vmem>>, %arg4: memref<32x5xf32, #tpu.memory_space<vmem>>, %arg5: memref<32x1xf32, #tpu.memory_space<vmem>>, %arg6: memref<32x32xf32, #tpu.memory_space<vmem>>, %arg7: memref<32x1xf32, #tpu.memory_space<vmem>>, %arg8: memref<32x1xf32, #tpu.memory_space<vmem>>, %arg9: memref<1x1xf32, #tpu.memory_space<vmem>>, %arg10: memref<1x1xf32, #tpu.memory_space<vmem>>, %arg11: memref<1x1x1024xf32, #tpu.memory_space<vmem>>) attributes {dimension_semantics = [#tpu.dimension_semantics<arbitrary>], iteration_bounds = array<i64: 1>, scalar_prefetch = 0 : i64, scratch_operands = 0 : i64, tpu.core_type = #tpu.core_type<tc>, window_params = [{transform_indices = @transform_0, window_bounds = array<i64: 1, 1, 1024>}, {transform_indices = @transform_1, window_bounds = array<i64: 1, 1, 1024>}, {transform_indices = @transform_2, window_bounds = array<i64: 1, 1, 1024>}, {pipeline_mode = #tpu.pipeline_mode<synchronous>, transform_indices = @transform_3, window_bounds = array<i64: 32, 5>}, {pipeline_mode = #tpu.pipeline_mode<synchronous>, transform_indices = @transform_4, window_bounds = array<i64: 32, 1>}, {pipeline_mode = #tpu.pipeline_mode<synchronous>, transform_indices = @transform_5, window_bounds = array<i64: 32, 32>}, {pipeline_mode = #tpu.pipeline_mode<synchronous>, transform_indices = @transform_6, window_bounds = array<i64: 32, 1>}, {pipeline_mode = #tpu.pipeline_mode<synchronous>, transform_indices = @transform_7, window_bounds = array<i64: 32, 1>}, {pipeline_mode = #tpu.pipeline_mode<synchronous>, transform_indices = @transform_8, window_bounds = array<i64: 1, 1>}, {pipeline_mode = #tpu.pipeline_mode<synchronous>, transform_indices = @transform_9, window_bounds = array<i64: 1, 1>}, {transform_indices = @transform_10, window_bounds = array<i64: 1, 1, 1024>}]} {
    %c0_i32 = arith.constant 0 : i32
    %0 = arith.cmpi eq, %arg0, %c0_i32 : i32
    %1 = arith.extui %0 : i1 to i32
    %c0_i32_0 = arith.constant 0 : i32
    %2 = arith.cmpi ne, %1, %c0_i32_0 : i32
    scf.if %2 {
      %cst_49 = arith.constant 0.000000e+00 : f32
      %114 = vector.broadcast %cst_49 : f32 to vector<1x1xf32>
      %c0_50 = arith.constant 0 : index
      %c0_51 = arith.constant 0 : index
      %115 = vector.load %arg10[%c0_50, %c0_51] : memref<1x1xf32, #tpu.memory_space<vmem>>, vector<1x1xf32>
      tpu.vector_store %arg10[%c0_50, %c0_51], %114 {strides = array<i32>} : memref<1x1xf32, #tpu.memory_space<vmem>>, vector<1x1xf32>,
    } else {
    }
    %c0 = arith.constant 0 : index
    %c0_1 = arith.constant 0 : index
    %c0_2 = arith.constant 0 : index
    %3 = vector.load %arg1[%c0, %c0_1, %c0_2] : memref<1x1x1024xf32, #tpu.memory_space<vmem>>, vector<1x1x1024xf32>
    %4 = vector.shape_cast %3 : vector<1x1x1024xf32> to vector<1x1024xf32>
    %c0_3 = arith.constant 0 : index
    %c0_4 = arith.constant 0 : index
    %c0_5 = arith.constant 0 : index
    %5 = vector.load %arg2[%c0_3, %c0_4, %c0_5] : memref<1x1x1024xf32, #tpu.memory_space<vmem>>, vector<1x1x1024xf32>
    %6 = vector.shape_cast %5 : vector<1x1x1024xf32> to vector<1x1024xf32>
    %c0_6 = arith.constant 0 : index
    %c0_7 = arith.constant 0 : index
    %c0_8 = arith.constant 0 : index
    %7 = vector.load %arg3[%c0_6, %c0_7, %c0_8] : memref<1x1x1024xf32, #tpu.memory_space<vmem>>, vector<1x1x1024xf32>
    %8 = vector.shape_cast %7 : vector<1x1x1024xf32> to vector<1x1024xf32>
    %cst = arith.constant 1.000000e-01 : f32
    %9 = vector.broadcast %cst : f32 to vector<1x1024xf32>
    %10 = arith.addf %6, %9 : vector<1x1024xf32>
    %11 = arith.divf %4, %10 : vector<1x1024xf32>
    %cst_9 = arith.constant 1.000000e-01 : f32
    %12 = vector.broadcast %cst_9 : f32 to vector<1x1024xf32>
    %13 = arith.addf %4, %12 : vector<1x1024xf32>
    %14 = arith.divf %6, %13 : vector<1x1024xf32>
    %c0_10 = arith.constant 0 : index
    %c0_11 = arith.constant 0 : index
    %15 = vector.load %arg4[%c0_10, %c0_11] : memref<32x5xf32, #tpu.memory_space<vmem>>, vector<32x5xf32>
    %16 = vector.extract_strided_slice %15 {offsets = [0, 0], sizes = [32, 1], strides = [1, 1]} : vector<32x5xf32> to vector<32x1xf32>
    %17 = vector.broadcast %16 : vector<32x1xf32> to vector<32x1024xf32>
    %18 = vector.broadcast %4 : vector<1x1024xf32> to vector<32x1024xf32>
    %19 = arith.mulf %17, %18 : vector<32x1024xf32>
    %20 = vector.extract_strided_slice %15 {offsets = [0, 1], sizes = [32, 1], strides = [1, 1]} : vector<32x5xf32> to vector<32x1xf32>
    %21 = vector.broadcast %20 : vector<32x1xf32> to vector<32x1024xf32>
    %22 = vector.broadcast %6 : vector<1x1024xf32> to vector<32x1024xf32>
    %23 = arith.mulf %21, %22 : vector<32x1024xf32>
    %24 = arith.addf %19, %23 : vector<32x1024xf32>
    %25 = vector.extract_strided_slice %15 {offsets = [0, 2], sizes = [32, 1], strides = [1, 1]} : vector<32x5xf32> to vector<32x1xf32>
    %26 = arith.subf %4, %6 : vector<1x1024xf32>
    %27 = vector.broadcast %25 : vector<32x1xf32> to vector<32x1024xf32>
    %28 = vector.broadcast %26 : vector<1x1024xf32> to vector<32x1024xf32>
    %29 = arith.mulf %27, %28 : vector<32x1024xf32>
    %30 = arith.addf %24, %29 : vector<32x1024xf32>
    %31 = vector.extract_strided_slice %15 {offsets = [0, 3], sizes = [32, 1], strides = [1, 1]} : vector<32x5xf32> to vector<32x1xf32>
    %32 = vector.broadcast %31 : vector<32x1xf32> to vector<32x1024xf32>
    %33 = vector.broadcast %11 : vector<1x1024xf32> to vector<32x1024xf32>
    %34 = arith.mulf %32, %33 : vector<32x1024xf32>
    %35 = arith.addf %30, %34 : vector<32x1024xf32>
    %36 = vector.extract_strided_slice %15 {offsets = [0, 4], sizes = [32, 1], strides = [1, 1]} : vector<32x5xf32> to vector<32x1xf32>
    %37 = vector.broadcast %36 : vector<32x1xf32> to vector<32x1024xf32>
    %38 = vector.broadcast %14 : vector<1x1024xf32> to vector<32x1024xf32>
    %39 = arith.mulf %37, %38 : vector<32x1024xf32>
    %40 = arith.addf %35, %39 : vector<32x1024xf32>
    %c0_12 = arith.constant 0 : index
    %c0_13 = arith.constant 0 : index
    %41 = vector.load %arg5[%c0_12, %c0_13] : memref<32x1xf32, #tpu.memory_space<vmem>>, vector<32x1xf32>
    %42 = vector.broadcast %41 : vector<32x1xf32> to vector<32x1024xf32>
    %43 = arith.addf %40, %42 : vector<32x1024xf32>
    %cst_14 = arith.constant 0.000000e+00 : f32
    %44 = vector.broadcast %cst_14 : f32 to vector<32x1024xf32>
    %45 = arith.cmpf ogt, %43, %44 : vector<32x1024xf32>
    %cst_15 = arith.constant 2.000000e-01 : f32
    %46 = vector.broadcast %cst_15 : f32 to vector<32x1024xf32>
    %47 = arith.mulf %46, %43 : vector<32x1024xf32>
    %48 = arith.select %45, %43, %47 : vector<32x1024xi1>, vector<32x1024xf32>
    %c0_16 = arith.constant 0 : index
    %c0_17 = arith.constant 0 : index
    %49 = vector.load %arg6[%c0_16, %c0_17] : memref<32x32xf32, #tpu.memory_space<vmem>>, vector<32x32xf32>
    %cst_18 = arith.constant dense<0.000000e+00> : vector<32x1024xf32>
    %50 = tpu.matmul %49, %48, %cst_18 {dimension_numbers = #tpu.dot_dimension_numbers<[1], [0], [0], [1], [0, 0, 1, 1], [], []>} : vector<32x32xf32>, vector<32x1024xf32>, vector<32x1024xf32> -> vector<32x1024xf32>
    %c0_19 = arith.constant 0 : index
    %c0_20 = arith.constant 0 : index
    %51 = vector.load %arg7[%c0_19, %c0_20] : memref<32x1xf32, #tpu.memory_space<vmem>>, vector<32x1xf32>
    %52 = vector.broadcast %51 : vector<32x1xf32> to vector<32x1024xf32>
    %53 = arith.addf %50, %52 : vector<32x1024xf32>
    %cst_21 = arith.constant 0.000000e+00 : f32
    %54 = vector.broadcast %cst_21 : f32 to vector<32x1024xf32>
    %55 = arith.cmpf ogt, %53, %54 : vector<32x1024xf32>
    %cst_22 = arith.constant 2.000000e-01 : f32
    %56 = vector.broadcast %cst_22 : f32 to vector<32x1024xf32>
    %57 = arith.mulf %56, %53 : vector<32x1024xf32>
    %58 = arith.select %55, %53, %57 : vector<32x1024xi1>, vector<32x1024xf32>
    %c0_23 = arith.constant 0 : index
    %c0_24 = arith.constant 0 : index
    %59 = vector.load %arg8[%c0_23, %c0_24] : memref<32x1xf32, #tpu.memory_space<vmem>>, vector<32x1xf32>
    %60 = vector.broadcast %59 : vector<32x1xf32> to vector<32x1024xf32>
    %61 = arith.mulf %58, %60 : vector<32x1024xf32>
    %cst_25 = arith.constant dense<0.000000e+00> : vector<1024xf32>
    %62 = vector.multi_reduction <add>, %61, %cst_25 [0] : vector<32x1024xf32> to vector<1024xf32>
    %63 = vector.shape_cast %62 : vector<1024xf32> to vector<1x1024xf32>
    %c0_26 = arith.constant 0 : index
    %c0_27 = arith.constant 0 : index
    %64 = vector.load %arg9[%c0_26, %c0_27] : memref<1x1xf32, #tpu.memory_space<vmem>>, vector<1x1xf32>
    %65 = vector.broadcast %64 : vector<1x1xf32> to vector<1x1024xf32>
    %66 = arith.addf %63, %65 : vector<1x1024xf32>
    %cst_28 = arith.constant 0.000000e+00 : f32
    %67 = vector.broadcast %cst_28 : f32 to vector<1x1024xf32>
    %68 = arith.subf %67, %66 : vector<1x1024xf32>
    %69 = math.exp %68 : vector<1x1024xf32>
    %cst_29 = arith.constant 1.000000e+00 : f32
    %70 = vector.broadcast %cst_29 : f32 to vector<1x1024xf32>
    %71 = arith.addf %70, %69 : vector<1x1024xf32>
    %cst_30 = arith.constant 1.000000e+00 : f32
    %72 = vector.broadcast %cst_30 : f32 to vector<1x1024xf32>
    %73 = arith.divf %72, %71 : vector<1x1024xf32>
    %74 = vector.shape_cast %73 : vector<1x1024xf32> to vector<1x1x1024xf32>
    %c0_31 = arith.constant 0 : index
    %c0_32 = arith.constant 0 : index
    %c0_33 = arith.constant 0 : index
    %75 = vector.load %arg11[%c0_31, %c0_32, %c0_33] : memref<1x1x1024xf32, #tpu.memory_space<vmem>>, vector<1x1x1024xf32>
    tpu.vector_store %arg11[%c0_31, %c0_32, %c0_33], %74 {strides = array<i32>} : memref<1x1x1024xf32, #tpu.memory_space<vmem>>, vector<1x1x1024xf32>,
    %cst_34 = arith.constant 1.000000e+00 : f32
    %76 = vector.broadcast %cst_34 : f32 to vector<1x1024xf32>
    %77 = arith.addf %8, %76 : vector<1x1024xf32>
    %cst_35 = arith.constant 5.000000e-01 : f32
    %78 = vector.broadcast %cst_35 : f32 to vector<1x1024xf32>
    %79 = arith.mulf %77, %78 : vector<1x1024xf32>
    %80 = math.log %73 : vector<1x1024xf32>
    %cst_36 = arith.constant -1.000000e+02 : f32
    %81 = vector.broadcast %cst_36 : f32 to vector<1x1024xf32>
    %82 = arith.maximumf %80, %81 : vector<1x1024xf32>
    %cst_37 = arith.constant 1.000000e+00 : f32
    %83 = vector.broadcast %cst_37 : f32 to vector<1x1024xf32>
    %84 = arith.subf %83, %73 : vector<1x1024xf32>
    %85 = math.log %84 : vector<1x1024xf32>
    %cst_38 = arith.constant -1.000000e+02 : f32
    %86 = vector.broadcast %cst_38 : f32 to vector<1x1024xf32>
    %87 = arith.maximumf %85, %86 : vector<1x1024xf32>
    %88 = arith.mulf %79, %82 : vector<1x1024xf32>
    %cst_39 = arith.constant 1.000000e+00 : f32
    %89 = vector.broadcast %cst_39 : f32 to vector<1x1024xf32>
    %90 = arith.subf %89, %79 : vector<1x1024xf32>
    %91 = arith.mulf %90, %87 : vector<1x1024xf32>
    %92 = arith.addf %88, %91 : vector<1x1024xf32>
    %cst_40 = arith.constant 0.000000e+00 : f32
    %93 = vector.broadcast %cst_40 : f32 to vector<1x1024xf32>
    %94 = arith.subf %93, %92 : vector<1x1024xf32>
    %95 = tpu.iota {dimensions = array<i32: 1>} : vector<1x1024xi32>
    %c1024_i32 = arith.constant 1024 : i32
    %96 = arith.muli %arg0, %c1024_i32 : i32
    %97 = vector.broadcast %96 : i32 to vector<1x1024xi32>
    %98 = arith.addi %97, %95 : vector<1x1024xi32>
    %c512_i32 = arith.constant 512 : i32
    %99 = vector.broadcast %c512_i32 : i32 to vector<1x1024xi32>
    %100 = arith.cmpi slt, %98, %99 : vector<1x1024xi32>
    %c0_41 = arith.constant 0 : index
    %c0_42 = arith.constant 0 : index
    %101 = vector.load %arg10[%c0_41, %c0_42] : memref<1x1xf32, #tpu.memory_space<vmem>>, vector<1x1xf32>
    %cst_43 = arith.constant 0.000000e+00 : f32
    %102 = vector.broadcast %cst_43 : f32 to vector<1x1024xf32>
    %103 = arith.select %100, %94, %102 : vector<1x1024xi1>, vector<1x1024xf32>
    %104 = vector.shape_cast %103 : vector<1x1024xf32> to vector<1x1x1024xf32>
    %cst_44 = arith.constant dense<0.000000e+00> : vector<1xf32>
    %105 = vector.multi_reduction <add>, %104, %cst_44 [1, 2] : vector<1x1x1024xf32> to vector<1xf32>
    %106 = vector.shape_cast %105 : vector<1xf32> to vector<1x1x1xf32>
    %107 = vector.extract %106[0, 0, 0] : f32 from vector<1x1x1xf32>
    %108 = vector.broadcast %107 : f32 to vector<1x1xf32>
    %109 = arith.addf %101, %108 : vector<1x1xf32>
    %c0_45 = arith.constant 0 : index
    %c0_46 = arith.constant 0 : index
    %110 = vector.load %arg10[%c0_45, %c0_46] : memref<1x1xf32, #tpu.memory_space<vmem>>, vector<1x1xf32>
    tpu.vector_store %arg10[%c0_45, %c0_46], %109 {strides = array<i32>} : memref<1x1xf32, #tpu.memory_space<vmem>>, vector<1x1xf32>,
    %c0_i32_47 = arith.constant 0 : i32
    %111 = arith.cmpi eq, %arg0, %c0_i32_47 : i32
    %112 = arith.extui %111 : i1 to i32
    %c0_i32_48 = arith.constant 0 : i32
    %113 = arith.cmpi ne, %112, %c0_i32_48 : i32
    scf.if %113 {
      %c0_49 = arith.constant 0 : index
      %c0_50 = arith.constant 0 : index
      %114 = vector.load %arg10[%c0_49, %c0_50] : memref<1x1xf32, #tpu.memory_space<vmem>>, vector<1x1xf32>
      %cst_51 = arith.constant 0.001953125 : f32
      %115 = vector.broadcast %cst_51 : f32 to vector<1x1xf32>
      %116 = arith.mulf %114, %115 : vector<1x1xf32>
      %c0_52 = arith.constant 0 : index
      %c0_53 = arith.constant 0 : index
      %117 = vector.load %arg10[%c0_52, %c0_53] : memref<1x1xf32, #tpu.memory_space<vmem>>, vector<1x1xf32>
      tpu.vector_store %arg10[%c0_52, %c0_53], %116 {strides = array<i32>} : memref<1x1xf32, #tpu.memory_space<vmem>>, vector<1x1xf32>,
    } else {
    }
    return
  }
  func.func @transform_0(%arg0: i32) -> (i32, i32, i32) {
    %c0_i32 = arith.constant 0 : i32
    %c0_i32_0 = arith.constant 0 : i32
    %c0_i32_1 = arith.constant 0 : i32
    return %arg0, %c0_i32, %c0_i32_0 : i32, i32, i32
  }
  func.func @transform_1(%arg0: i32) -> (i32, i32, i32) {
    %c0_i32 = arith.constant 0 : i32
    %c0_i32_0 = arith.constant 0 : i32
    %c0_i32_1 = arith.constant 0 : i32
    return %arg0, %c0_i32, %c0_i32_0 : i32, i32, i32
  }
  func.func @transform_2(%arg0: i32) -> (i32, i32, i32) {
    %c0_i32 = arith.constant 0 : i32
    %c0_i32_0 = arith.constant 0 : i32
    %c0_i32_1 = arith.constant 0 : i32
    return %arg0, %c0_i32, %c0_i32_0 : i32, i32, i32
  }
  func.func @transform_3(%arg0: i32) -> (i32, i32) {
    %c0_i32 = arith.constant 0 : i32
    %c0_i32_0 = arith.constant 0 : i32
    %c0_i32_1 = arith.constant 0 : i32
    return %c0_i32, %c0_i32_0 : i32, i32
  }
  func.func @transform_4(%arg0: i32) -> (i32, i32) {
    %c0_i32 = arith.constant 0 : i32
    %c0_i32_0 = arith.constant 0 : i32
    %c0_i32_1 = arith.constant 0 : i32
    return %c0_i32, %c0_i32_0 : i32, i32
  }
  func.func @transform_5(%arg0: i32) -> (i32, i32) {
    %c0_i32 = arith.constant 0 : i32
    %c0_i32_0 = arith.constant 0 : i32
    %c0_i32_1 = arith.constant 0 : i32
    return %c0_i32, %c0_i32_0 : i32, i32
  }
  func.func @transform_6(%arg0: i32) -> (i32, i32) {
    %c0_i32 = arith.constant 0 : i32
    %c0_i32_0 = arith.constant 0 : i32
    %c0_i32_1 = arith.constant 0 : i32
    return %c0_i32, %c0_i32_0 : i32, i32
  }
  func.func @transform_7(%arg0: i32) -> (i32, i32) {
    %c0_i32 = arith.constant 0 : i32
    %c0_i32_0 = arith.constant 0 : i32
    %c0_i32_1 = arith.constant 0 : i32
    return %c0_i32, %c0_i32_0 : i32, i32
  }
  func.func @transform_8(%arg0: i32) -> (i32, i32) {
    %c0_i32 = arith.constant 0 : i32
    %c0_i32_0 = arith.constant 0 : i32
    %c0_i32_1 = arith.constant 0 : i32
    return %c0_i32, %c0_i32_0 : i32, i32
  }
  func.func @transform_9(%arg0: i32) -> (i32, i32) {
    %c0_i32 = arith.constant 0 : i32
    %c0_i32_0 = arith.constant 0 : i32
    %c0_i32_1 = arith.constant 0 : i32
    return %c0_i32, %c0_i32_0 : i32, i32
  }
  func.func @transform_10(%arg0: i32) -> (i32, i32, i32) {
    %c0_i32 = arith.constant 0 : i32
    %c0_i32_0 = arith.constant 0 : i32
    %c0_i32_1 = arith.constant 0 : i32
    return %arg0, %c0_i32, %c0_i32_0 : i32, i32, i32
  }
}

</mosaic_0001>

<bundles_post_ra>
// kernel: tpu_custom_call.1
= control target key start
LH: loop header
LB: loop body
LE: loop exit
PB: predicated region body
PF: predicated region fallthrough
CT: control target
= control target key end

     0   :  { %s3154_s0 = inlined_call_operand.vmem [shape: f32[1,1,1024], index: 0, kind: input, shape index: {}]   ;;  %s3155_s1 = inlined_call_operand.vmem [shape: f32[1,1,1024], index: 1, kind: input, shape index: {}]   ;;  %s3156_s2 = inlined_call_operand.vmem [shape: f32[1,1,1024], index: 2, kind: input, shape index: {}]   ;;  %s3157_s3 = inlined_call_operand.vmem [shape: f32[32,5], index: 3, kind: input, shape index: {}]   ;;  %s3158_s4 = inlined_call_operand.vmem [shape: f32[32,1], index: 4, kind: input, shape index: {}]   ;;  %s3159_s5 = inlined_call_operand.vmem [shape: f32[32,32], index: 5, kind: input, shape index: {}]   ;;  %s3160_s6 = inlined_call_operand.vmem [shape: f32[32,1], index: 6, kind: input, shape index: {}]   ;;  %s3161_s7 = inlined_call_operand.vmem [shape: f32[32,1], index: 7, kind: input, shape index: {}]   ;;  %s3162_s8 = inlined_call_operand.<no memory space> [shape: f32[1,1], index: 8, kind: input, shape index: {}]   ;;  %s3163_s9 = inlined_call_operand.hbm [shape: f32[1,1], index: 9, kind: output, shape index: {0}]   ;;  %s3164_s10 = inlined_call_operand.hbm [shape: f32[1,1,1024], index: 10, kind: output, shape index: {1}]  }
   0x1   :  { %v16_v0 = vstv %s3162_s8 }
   0x2   :  { %17 = vst [vmem:[#allocation2] sm:$0x1] %v16_v0 }
   0x3   :  { %18 = vsyncpa [#allocation4], 0  ;;  %v53_v1 = vld [vmem:[%s3157_s3] sm:$0xff]  ;;  %v2042_v2 = vmov 1   ;;  %v2043_v3 = vmov 0   ;;  %v54_v4 = vld [vmem:[%s3157_s3 + $0x8] sm:$0xff] }
   0x4   :  { %1912 = vset.pattern.permute.xlu1 %v2042_v2  ;;  %1911 = vset.pattern.permute.xlu0 %v2043_v3 }
   0x5   :  { %151 = vperm.xlu1 %1912, %v53_v1   ;;  %59 = vperm.xlu0 %1911, %v53_v1  }
   0x9   :  { %155 = vperm.xlu1 %1912, %v54_v4   ;;  %64 = vperm.xlu0 %1911, %v54_v4  }
   0xa   :  { %19 = vsyncpa [#allocation6], 0  ;;  %v56_v5 = vld [vmem:[%s3157_s3 + $0x18] sm:$0xff]  ;;  %v2044_v6 = vmov 2   ;;  %v55_v7 = vld [vmem:[%s3157_s3 + $0x10] sm:$0xff]  ;;  %v2045_v8 = vmov 3   ;;  %v78_v28 = vlaneseq }
   0xb   :  { %v2046_v9 = vmov 4   ;;  %v637_v10 = vld [vmem:[%s3158_s4 + $0x10] sm:$0xff]  ;;  %v792_v11 = vld [vmem:[%s3160_s6 + $0x8] sm:$0xff]  ;;  %v794_v12 = vld [vmem:[%s3160_s6 + $0x18] sm:$0xff]  ;;  %v3165_v23 = vmov 0.0   ;;  %vm815_vm12 = vcmask 261120  }
   0xc   :  { %v1281_v13 = vld [vmem:[%s3161_s7 + $0x8] sm:$0xff]  ;;  %v1283_v14 = vld [vmem:[%s3161_s7 + $0x18] sm:$0xff]  ;;  %v635_v15 = vld [vmem:[%s3158_s4] sm:$0xff]  ;;  %892 = vmatprep.mubr.f32.mxu0 %v3165_v23  ;;  %981 = vmatprep.mubr.f32.mxu1 %v3165_v23  ;;  %v2165_v29 = vshrl.u32 %v78_v28, 7 }
   0xd   :  { %1913 = vset.pattern.permute.xlu1 %v2044_v6  ;;  %74 = vperm.xlu0 %1911, %v56_v5   ;;  %v636_v16 = vld [vmem:[%s3158_s4 + $0x8] sm:$0xff]  ;;  %v638_v17 = vld [vmem:[%s3158_s4 + $0x18] sm:$0xff]  ;;  %v791_v18 = vld [vmem:[%s3160_s6] sm:$0xff] }
   0xe   :  { %277 = vperm.xlu1 %1913, %v54_v4   ;;  %v793_v19 = vld [vmem:[%s3160_s6 + $0x10] sm:$0xff]  ;;  %v1280_v20 = vld [vmem:[%s3161_s7] sm:$0xff]  ;;  %3205 = vst [vmem:[#allocation9_spill] sm:$0xff] %v2165_v29  ;;  %v96_v30 = vsub.s32 4, %v2165_v29  ;;  %v104_v31 = vsub.s32 6, %v2165_v29  ;;  %v2170_v32 = vsub.s32 1, %v2165_v29 }
   0xf   :  { %v1282_v21 = vld [vmem:[%s3161_s7 + $0x10] sm:$0xff]  ;;  %v1408_v22 = vld [vmem:[#allocation2] sm:$0x1]  ;;  %v2173_v33 = vsub.s32 3, %v2165_v29  ;;  %v2178_v37 = vsub.s32 0, %v2165_v29  ;;  %v2188_v42 = vsub.s32 2, %v2165_v29 }
  0x10   :  { %v45_v24 = vld [vmem:[%s3155_s1] sm:$0xff]  ;;  %3206 = vst [vmem:[#allocation10_spill] sm:$0xff] %v2170_v32  ;;  %v100_v46 = vsub.s32 5, %v2165_v29  ;;  %v108_v50 = vsub.s32 7, %v2165_v29 }
  0x11   :  { %1915 = vset.pattern.permute.xlu0 %v2044_v6  ;;  %v44_v25 = vld [vmem:[%s3154_s0] sm:$0xff]  ;;  %v47_v26 = vadd.f32 0.1, %v45_v24  ;;  %3207 = vst [vmem:[#allocation11_spill] sm:$0xff] %v2173_v33  ;;  %v2175_v36 = vrot.slane %v45_v24, %v96_v30  ;;  %3208 = vst [vmem:[#allocation12_spill] sm:$0xff] %v2178_v37  ;;  %v2180_v39 = vrot.slane %v45_v24, %v104_v31 }
  0x12   :  { %1914 = vset.pattern.permute.xlu1 %v2043_v3  ;;  %273 = vperm.xlu0 %1915, %v53_v1   ;;  %v50_v27 = vadd.f32 0.1, %v44_v25  ;;  %v271_v34 = vsub.f32 %v44_v25, %v45_v24  ;;  %v2182_v40 = vrot.slane %v44_v25, %v96_v30  ;;  %v2185_v41 = vrot.slane %v45_v24, %v2170_v32 }
  0x13   :  { %69 = vperm.xlu1 %1914, %v55_v7   ;;  %1926 = vrcp.f32 %v47_v26  ;;  %3209 = vst [vmem:[#allocation13_spill] sm:$0xff] %v2188_v42  ;;  %v2190_v43 = vrot.slane %v44_v25, %v104_v31  ;;  %v2193_v44 = vrot.slane %v44_v25, %v2170_v32  ;;  %v2196_v45 = vrot.slane %v44_v25, %v2173_v33 }
  0x14   :  { %1928 = vrcp.f32 %v50_v27  ;;  %v2199_v47 = vrot.slane %v271_v34, %v96_v30  ;;  %v2202_v49 = vrot.slane %v45_v24, %v2173_v33  ;;  %v2205_v51 = vrot.slane %v271_v34, %v104_v31 }
  0x15   :  { %v2208_v53 = vrot.slane %v44_v25, %v2178_v37  ;;  %v2211_v54 = vrot.slane %v45_v24, %v2178_v37  ;;  %v2214_v55 = vrot.slane %v271_v34, %v2170_v32  ;;  %v2217_v56 = vrot.slane %v271_v34, %v2173_v33 }
  0x16   :  { %285 = vperm.xlu0 %1915, %v56_v5   ;;  %v2220_v57 = vrot.slane %v44_v25, %v2188_v42  ;;  %v2223_v58 = vrot.slane %v45_v24, %v2188_v42  ;;  %v2226_v59 = vrot.slane %v271_v34, %v2178_v37  ;;  %v2229_v60 = vrot.slane %v271_v34, %v2188_v42 }
  0x17   :  { %1916 = vset.pattern.permute.xlu1 %v2042_v2  ;;  %v2231_v61 = vrot.slane %v44_v25, %v100_v46  ;;  %v2233_v62 = vrot.slane %v45_v24, %v100_v46  ;;  %v2243_v2 = vrot.slane %v45_v24, %v108_v50 }
  0x18   :  { %159 = vperm.xlu1 %1916, %v55_v7  }
  0x19   :  { %3210 = vst [vmem:[#allocation14_spill] sm:$0xff] %v2231_v61  ;;  %3211 = vst [vmem:[#allocation15_spill] sm:$0xff] %v2233_v62 }
  0x1a   :  { %1919 = vset.pattern.permute.xlu0 %v2045_v8 }
  0x1b   :  { %394 = vperm.xlu0 %1919, %v53_v1  }
  0x1c   :  { %163 = vperm.xlu1 %1916, %v56_v5  }
  0x1d   :  { %v1927_v35 = vpop.eup %1926 }
  0x1e   :  { %v1929_v38 = vpop.eup %1928  ;;  %v49_v48 = vmul.f32 %v1927_v35, %v44_v25 }
  0x1f   :  { %402 = vperm.xlu0 %1919, %v55_v7   ;;  %v52_v52 = vmul.f32 %v1929_v38, %v45_v24 }
  0x20   :  { %1917 = vset.pattern.permute.xlu1 %v2045_v8  ;;  %v2236_v63 = vrot.slane %v49_v48, %v2170_v32  ;;  %v2239_v0 = vrot.slane %v49_v48, %v2173_v33 }
  0x21   :  { %398 = vperm.xlu1 %1917, %v54_v4  }
  0x23   :  { %1923 = vset.pattern.permute.xlu0 %v2046_v9 }
  0x24   :  { %527 = vperm.xlu0 %1923, %v56_v5  }
  0x25   :  { %1918 = vset.pattern.permute.xlu1 %v2044_v6  ;;  %v2254_v6 = vrot.slane %v271_v34, %v100_v46 }
  0x26   :  { %281 = vperm.xlu1 %1918, %v55_v7  }
  0x27   :  { %3213 = vst [vmem:[#allocation17_spill] sm:$0xff] %v2254_v6 }
  0x28   :  { %1925 = vset.pattern.permute.xlu0 %v2043_v3 }
  0x29   :  { %651 = vperm.xlu0 %1925, %v637_v10   ;;  %v2265_v10 = vrot.slane %v49_v48, %v100_v46 }
  0x2a   :  { %1920 = vset.pattern.permute.xlu1 %v2046_v9 }
  0x2b   :  { %515 = vperm.xlu1 %1920, %v53_v1   ;;  %v2241_v1 = vrot.slane %v44_v25, %v108_v50 }
  0x2d   :  { %802 = vperm.xlu0 %1925, %v792_v11   ;;  %3212 = vst [vmem:[#allocation16_spill] sm:$0xff] %v2241_v1  ;;  %v2267_v11 = vrot.slane %v52_v52, %v100_v46 }
  0x2f   :  { %519 = vperm.xlu1 %1920, %v54_v4   ;;  %v2249_v4 = vrot.slane %v49_v48, %v2178_v37  ;;  %3214 = vst [vmem:[#allocation18_spill] sm:$0xff] %v2267_v11 }
  0x31   :  { %812 = vperm.xlu0 %1925, %v794_v12   ;;  %v2269_v12 = vrot.slane %v271_v34, %v108_v50 }
  0x33   :  { %1921 = vset.pattern.permute.xlu1 %v2045_v8  ;;  %v2260_v8 = vrot.slane %v52_v52, %v2178_v37  ;;  %3215 = vst [vmem:[#allocation19_spill] sm:$0xff] %v2269_v12 }
  0x34   :  { %406 = vperm.xlu1 %1921, %v56_v5   ;;  %v2252_v5 = vrot.slane %v49_v48, %v2188_v42 }
  0x35   :  { %1291 = vperm.xlu0 %1925, %v1281_v13   ;;  %v2271_v13 = vrot.slane %v49_v48, %v108_v50 }
  0x37   :  { %3216 = vst [vmem:[#allocation20_spill] sm:$0xff] %v2271_v13 }
  0x38   :  { %1922 = vset.pattern.permute.xlu1 %v2046_v9  ;;  %v2263_v9 = vrot.slane %v52_v52, %v2188_v42 }
  0x39   :  { %523 = vperm.xlu1 %1922, %v55_v7   ;;  %1301 = vperm.xlu0 %1925, %v1283_v14   ;;  %v2257_v7 = vrot.slane %v52_v52, %v2173_v33  ;;  %v2273_v14 = vrot.slane %v49_v48, %v96_v30 }
  0x3b   :  { %3217 = vst [vmem:[#allocation21_spill] sm:$0xff] %v2273_v14 }
  0x3d   :  { %1924 = vset.pattern.permute.xlu1 %v2043_v3  ;;  %v2246_v3 = vrot.slane %v52_v52, %v2170_v32 }
  0x3e   :  { %641 = vperm.xlu1 %1924, %v635_v15  }
  0x42   :  { %646 = vperm.xlu1 %1924, %v636_v16  }
  0x46   :  { %656 = vperm.xlu1 %1924, %v638_v17   ;;  %v2279_v17 = vrot.slane %v52_v52, %v108_v50 }
  0x48   :  { %3218 = vst [vmem:[#allocation22_spill] sm:$0xff] %v2279_v17 }
  0x4a   :  { %797 = vperm.xlu1 %1924, %v791_v18   ;;  %v2281_v18 = vrot.slane %v52_v52, %v96_v30 }
  0x4c   :  { %3219 = vst [vmem:[#allocation23_spill] sm:$0xff] %v2281_v18 }
  0x4e   :  { %807 = vperm.xlu1 %1924, %v793_v19   ;;  %v2283_v19 = vrot.slane %v49_v48, %v104_v31 }
  0x50   :  { %3220 = vst [vmem:[#allocation24_spill] sm:$0xff] %v2283_v19 }
  0x52   :  { %1286 = vperm.xlu1 %1924, %v1280_v20   ;;  %v2285_v20 = vrot.slane %v52_v52, %v104_v31 }
  0x54   :  { %3221 = vst [vmem:[#allocation25_spill] sm:$0xff] %v2285_v20 }
  0x56   :  { %1296 = vperm.xlu1 %1924, %v1282_v21  }
  0x5a   :  { %1411 = vperm.xlu1 %1924, %v1408_v22  }
  0x84   :  { %v2275_v15 = vpop.permute.xlu1 %151  ;;  %v2277_v16 = vpop.permute.xlu0 %59 }
  0x85   :  { %v2289_v21 = vmul.f32 %v2175_v36, %v2275_v15  ;;  %v2293_v22 = vmul.f32 %v2180_v39, %v2275_v15  ;;  %v2297_v24 = vmul.f32 %v2182_v40, %v2277_v16  ;;  %v2301_v25 = vmul.f32 %v2190_v43, %v2277_v16 }
  0x86   :  { %v119_v26 = vmul.f32 %v2193_v44, %v2277_v16  ;;  %v208_v27 = vmul.f32 %v2185_v41, %v2275_v15  ;;  %v121_v28 = vmul.f32 %v2196_v45, %v2277_v16  ;;  %v210_v30 = vmul.f32 %v2202_v49, %v2275_v15 }
  0x87   :  { %3222 = vst [vmem:[#allocation26_spill] sm:$0xff] %v2289_v21  ;;  %3223 = vst [vmem:[#allocation27_spill] sm:$0xff] %v2293_v22  ;;  %v118_v31 = vmul.f32 %v2208_v53, %v2277_v16  ;;  %v207_v34 = vmul.f32 %v2211_v54, %v2275_v15  ;;  %v120_v35 = vmul.f32 %v2220_v57, %v2277_v16 }
  0x88   :  { %3224 = vst [vmem:[#allocation28_spill] sm:$0xff] %v2297_v24  ;;  %3225 = vst [vmem:[#allocation29_spill] sm:$0xff] %v2301_v25  ;;  %v209_v38 = vmul.f32 %v2223_v58, %v2275_v15  ;;  %v2319_v46 = vpop.permute.xlu1 %155  ;;  %v2321_v48 = vpop.permute.xlu0 %64  ;;  %v240_v50 = vadd.f32 %v208_v27, %v119_v26  ;;  %v242_v52 = vadd.f32 %v210_v30, %v121_v28 }
  0x89   :  { %3226 = vst [vmem:[#allocation30_spill] sm:$0xff] %v2319_v46  ;;  %v2325_v23 = vmul.f32 %v2231_v61, %v2277_v16  ;;  %v2329_v33 = vmul.f32 %v2233_v62, %v2275_v15  ;;  %v2333_v42 = vmul.f32 %v2175_v36, %v2319_v46  ;;  %v2337_v32 = vmul.f32 %v2180_v39, %v2319_v46 }
  0x8a   :  { %v2341_v26 = vmul.f32 %v2182_v40, %v2321_v48  ;;  %v2345_v27 = vmul.f32 %v2190_v43, %v2321_v48  ;;  %v127_v28 = vmul.f32 %v2193_v44, %v2321_v48  ;;  %v216_v30 = vmul.f32 %v2185_v41, %v2319_v46 }
  0x8b   :  { %3227 = vst [vmem:[#allocation31_spill] sm:$0xff] %v2333_v42  ;;  %3228 = vst [vmem:[#allocation32_spill] sm:$0xff] %v2337_v32  ;;  %v129_v29 = vmul.f32 %v2196_v45, %v2321_v48  ;;  %v218_v37 = vmul.f32 %v2202_v49, %v2319_v46  ;;  %v126_v20 = vmul.f32 %v2208_v53, %v2321_v48 }
  0x8c   :  { %3229 = vst [vmem:[#allocation33_spill] sm:$0xff] %v2341_v26  ;;  %3230 = vst [vmem:[#allocation34_spill] sm:$0xff] %v2345_v27  ;;  %v215_v19 = vmul.f32 %v2211_v54, %v2319_v46  ;;  %v239_v32 = vadd.f32 %v207_v34, %v118_v31  ;;  %v128_v27 = vmul.f32 %v2220_v57, %v2321_v48  ;;  %v2361_v22 = vpop.permute.xlu0 %74 }
  0x8d   :  { %3231 = vst [vmem:[#allocation35_spill] sm:$0xff] %v2361_v22  ;;  %v248_v25 = vadd.f32 %v216_v30, %v127_v28  ;;  %v250_v18 = vadd.f32 %v218_v37, %v129_v29  ;;  %v217_v14 = vmul.f32 %v2223_v58, %v2319_v46  ;;  %v241_v42 = vadd.f32 %v209_v38, %v120_v35  ;;  %v2365_v26 = vpop.permute.xlu1 %277 }
  0x8e   :  { %3232 = vst [vmem:[#allocation36_spill] sm:$0xff] %v2365_v26  ;;  %v2369_v21 = vmul.f32 %v2182_v40, %v2361_v22  ;;  %v2373_v31 = vmul.f32 %v2190_v43, %v2361_v22  ;;  %v247_v34 = vadd.f32 %v215_v19, %v126_v20  ;;  %v2377_v24 = vmul.f32 %v2193_v44, %v2361_v22 }
  0x8f   :  { %v2381_v29 = vmul.f32 %v2199_v47, %v2365_v26  ;;  %v2385_v37 = vmul.f32 %v2205_v51, %v2365_v26  ;;  %v338_v35 = vmul.f32 %v2214_v55, %v2365_v26  ;;  %v340_v38 = vmul.f32 %v2217_v56, %v2365_v26 }
  0x90   :  { %3233 = vst [vmem:[#allocation37_spill] sm:$0xff] %v2369_v21  ;;  %3234 = vst [vmem:[#allocation38_spill] sm:$0xff] %v2373_v31  ;;  %v337_v19 = vmul.f32 %v2226_v59, %v2365_v26  ;;  %v249_v20 = vadd.f32 %v217_v14, %v128_v27  ;;  %v339_v28 = vmul.f32 %v2229_v60, %v2365_v26 }
  0x91   :  { %3235 = vst [vmem:[#allocation39_spill] sm:$0xff] %v2381_v29  ;;  %3236 = vst [vmem:[#allocation40_spill] sm:$0xff] %v2385_v37  ;;  %v2397_v30 = vmul.f32 %v2196_v45, %v2361_v22  ;;  %v2399_v31 = vadd.f32 %v338_v35, %v248_v25  ;;  %v2401_v21 = vadd.f32 %v340_v38, %v250_v18  ;;  %v2411_v14 = vpop.permute.xlu0 %273 }
  0x92   :  { %v2405_v37 = vmul.f32 %v2208_v53, %v2361_v22  ;;  %v2409_v29 = vmul.f32 %v2220_v57, %v2361_v22  ;;  %v2413_v27 = vadd.f32 %v337_v19, %v247_v34  ;;  %v2415_v17 = vadd.f32 %v339_v28, %v249_v20  ;;  %v2429_v22 = vpop.permute.xlu1 %69 }
  0x93   :  { %v131_v25 = vmul.f32 %v2231_v61, %v2321_v48  ;;  %v220_v18 = vmul.f32 %v2233_v62, %v2319_v46  ;;  %v2423_v35 = vmul.f32 %v2199_v47, %v2411_v14  ;;  %v2427_v38 = vmul.f32 %v2205_v51, %v2411_v14  ;;  %3239 = vst [vmem:[#allocation43_spill] sm:$0xff] %v2429_v22 }
  0x94   :  { %v330_v34 = vmul.f32 %v2214_v55, %v2411_v14  ;;  %v332_v19 = vmul.f32 %v2217_v56, %v2411_v14  ;;  %v2437_v20 = vmul.f32 %v2182_v40, %v2429_v22  ;;  %v2441_v28 = vmul.f32 %v2190_v43, %v2429_v22 }
  0x95   :  { %3237 = vst [vmem:[#allocation41_spill] sm:$0xff] %v2423_v35  ;;  %3238 = vst [vmem:[#allocation42_spill] sm:$0xff] %v2427_v38  ;;  %v329_v62 = vmul.f32 %v2226_v59, %v2411_v14  ;;  %v331_v61 = vmul.f32 %v2229_v60, %v2411_v14  ;;  %v135_v13 = vmul.f32 %v2193_v44, %v2429_v22  ;;  %v2451_v40 = vpop.permute.xlu0 %285 }
  0x96   :  { %3240 = vst [vmem:[#allocation44_spill] sm:$0xff] %v2437_v20  ;;  %3241 = vst [vmem:[#allocation45_spill] sm:$0xff] %v2441_v28  ;;  %v362_v38 = vadd.f32 %v330_v34, %v240_v50  ;;  %v364_v35 = vadd.f32 %v332_v19, %v242_v52  ;;  %v137_v11 = vmul.f32 %v2196_v45, %v2429_v22 }
  0x97   :  { %3242 = vst [vmem:[#allocation46_spill] sm:$0xff] %v2451_v40  ;;  %v361_v20 = vadd.f32 %v329_v62, %v239_v32  ;;  %v363_v12 = vadd.f32 %v331_v61, %v241_v42  ;;  %v134_v43 = vmul.f32 %v2208_v53, %v2429_v22  ;;  %v136_v28 = vmul.f32 %v2220_v57, %v2429_v22  ;;  %v2469_v42 = vpop.permute.xlu1 %159 }
  0x98   :  { %v2459_v50 = vmul.f32 %v2199_v47, %v2451_v40  ;;  %v2463_v44 = vmul.f32 %v2205_v51, %v2451_v40  ;;  %v354_v45 = vmul.f32 %v2214_v55, %v2451_v40  ;;  %v356_v32 = vmul.f32 %v2217_v56, %v2451_v40  ;;  %3245 = vst [vmem:[#allocation49_spill] sm:$0xff] %v2469_v42 }
  0x99   :  { %v353_v53 = vmul.f32 %v2226_v59, %v2451_v40  ;;  %v355_v57 = vmul.f32 %v2229_v60, %v2451_v40  ;;  %v244_v61 = vadd.f32 %v2329_v33, %v2325_v23  ;;  %v252_v62 = vadd.f32 %v220_v18, %v131_v25 }
  0x9a   :  { %3243 = vst [vmem:[#allocation47_spill] sm:$0xff] %v2459_v50  ;;  %3244 = vst [vmem:[#allocation48_spill] sm:$0xff] %v2463_v44  ;;  %v2479_v52 = vmul.f32 %v2175_v36, %v2469_v42  ;;  %v2483_v34 = vmul.f32 %v2180_v39, %v2469_v42  ;;  %v224_v19 = vmul.f32 %v2185_v41, %v2469_v42  ;;  %v2497_v18 = vpop.permute.xlu0 %394 }
  0x9b   :  { %v226_v44 = vmul.f32 %v2202_v49, %v2469_v42  ;;  %v223_v50 = vmul.f32 %v2211_v54, %v2469_v42  ;;  %v225_v23 = vmul.f32 %v2223_v58, %v2469_v42  ;;  %v334_v33 = vmul.f32 %v2254_v6, %v2411_v14  ;;  %v2507_v46 = vpop.permute.xlu1 %163 }
  0x9c   :  { %3246 = vst [vmem:[#allocation50_spill] sm:$0xff] %v2479_v52  ;;  %3247 = vst [vmem:[#allocation51_spill] sm:$0xff] %v2483_v34  ;;  %v342_v25 = vmul.f32 %v2254_v6, %v2365_v26  ;;  %v256_v34 = vadd.f32 %v224_v19, %v135_v13  ;;  %v2501_v40 = vmul.f32 %v2241_v1, %v2277_v16 }
  0x9d   :  { %v258_v52 = vadd.f32 %v226_v44, %v137_v11  ;;  %v2505_v22 = vmul.f32 %v2241_v1, %v2321_v48  ;;  %v451_v42 = vmul.f32 %v2236_v63, %v2497_v18  ;;  %v453_v6 = vmul.f32 %v2239_v0, %v2497_v18 }
  0x9e   :  { %3248 = vst [vmem:[#allocation52_spill] sm:$0xff] %v2501_v40  ;;  %v450_v13 = vmul.f32 %v2249_v4, %v2497_v18  ;;  %v452_v11 = vmul.f32 %v2252_v5, %v2497_v18  ;;  %v2519_v16 = vmul.f32 %v2175_v36, %v2507_v46  ;;  %v2523_v48 = vmul.f32 %v2180_v39, %v2507_v46  ;;  %v2537_v36 = vpop.permute.xlu0 %402 }
  0x9f   :  { %3249 = vst [vmem:[#allocation53_spill] sm:$0xff] %v2505_v22  ;;  %v232_v44 = vmul.f32 %v2185_v41, %v2507_v46  ;;  %v234_v19 = vmul.f32 %v2202_v49, %v2507_v46  ;;  %v2529_v1 = vadd.f32 %v451_v42, %v362_v38  ;;  %v2531_v22 = vadd.f32 %v453_v6, %v364_v35 }
  0xa0   :  { %3250 = vst [vmem:[#allocation54_spill] sm:$0xff] %v2519_v16  ;;  %3251 = vst [vmem:[#allocation55_spill] sm:$0xff] %v2523_v48  ;;  %v2533_v40 = vadd.f32 %v450_v13, %v361_v20  ;;  %v2535_v26 = vadd.f32 %v452_v11, %v363_v12  ;;  %v231_v41 = vmul.f32 %v2211_v54, %v2507_v46  ;;  %v2551_v38 = vpop.permute.xlu1 %398 }
  0xa1   :  { %v264_v16 = vadd.f32 %v232_v44, %v2377_v24  ;;  %v266_v39 = vadd.f32 %v234_v19, %v2397_v30  ;;  %v255_v48 = vadd.f32 %v223_v50, %v134_v43  ;;  %v467_v49 = vmul.f32 %v2236_v63, %v2537_v36 }
  0xa2   :  { %v469_v6 = vmul.f32 %v2239_v0, %v2537_v36  ;;  %v466_v12 = vmul.f32 %v2249_v4, %v2537_v36  ;;  %v233_v35 = vmul.f32 %v2223_v58, %v2507_v46  ;;  %v263_v54 = vadd.f32 %v231_v41, %v2405_v37 }
  0xa3   :  { %v2553_v24 = vadd.f32 %v354_v45, %v264_v16  ;;  %v2555_v30 = vadd.f32 %v356_v32, %v266_v39  ;;  %v257_v20 = vadd.f32 %v225_v23, %v136_v28  ;;  %v459_v43 = vmul.f32 %v2236_v63, %v2551_v38  ;;  %v2571_v32 = vpop.permute.xlu0 %527 }
  0xa4   :  { %v461_v50 = vmul.f32 %v2239_v0, %v2551_v38  ;;  %v458_v42 = vmul.f32 %v2249_v4, %v2551_v38  ;;  %v460_v58 = vmul.f32 %v2252_v5, %v2551_v38  ;;  %v2566_v13 = vadd.f32 %v353_v53, %v263_v54  ;;  %3252 = vst [vmem:[#allocation56_spill] sm:$0xff] %v2571_v32 }
  0xa5   :  { %v265_v45 = vadd.f32 %v233_v35, %v2409_v29  ;;  %v468_v37 = vmul.f32 %v2252_v5, %v2537_v36  ;;  %v366_v28 = vadd.f32 %v334_v33, %v244_v61  ;;  %v491_v23 = vadd.f32 %v459_v43, %v2399_v31  ;;  %v2591_v31 = vpop.permute.xlu1 %281 }
  0xa6   :  { %v493_v11 = vadd.f32 %v461_v50, %v2401_v21  ;;  %v490_v16 = vadd.f32 %v458_v42, %v2413_v27  ;;  %v492_v44 = vadd.f32 %v460_v58, %v2415_v17  ;;  %v2579_v53 = vmul.f32 %v2246_v3, %v2571_v32  ;;  %v3255_v42 = vld [vmem:[#allocation30_spill] sm:$0xff] }
  0xa7   :  { %v2583_v29 = vmul.f32 %v2257_v7, %v2571_v32  ;;  %v2587_v61 = vmul.f32 %v2260_v8, %v2571_v32  ;;  %v2589_v33 = vadd.f32 %v355_v57, %v265_v45  ;;  %v2595_v21 = vmul.f32 %v2263_v9, %v2571_v32 }
  0xa8   :  { %v374_v17 = vadd.f32 %v342_v25, %v252_v62  ;;  %v455_v27 = vmul.f32 %v2265_v10, %v2497_v18  ;;  %v463_v19 = vmul.f32 %v2265_v10, %v2551_v38  ;;  %v2603_v39 = vmul.f32 %v2199_v47, %v2591_v31 }
  0xa9   :  { %v2607_v57 = vmul.f32 %v2205_v51, %v2591_v31  ;;  %v346_v41 = vmul.f32 %v2214_v55, %v2591_v31  ;;  %v348_v62 = vmul.f32 %v2217_v56, %v2591_v31  ;;  %v345_v25 = vmul.f32 %v2226_v59, %v2591_v31  ;;  %v3256_v56 = vld [vmem:[#allocation19_spill] sm:$0xff] }
  0xaa   :  { %3253 = vst [vmem:[#allocation57_spill] sm:$0xff] %v2603_v39  ;;  %v347_v35 = vmul.f32 %v2229_v60, %v2591_v31  ;;  %v487_v54 = vadd.f32 %v455_v27, %v366_v28  ;;  %v495_v43 = vadd.f32 %v463_v19, %v374_v17  ;;  %v214_v51 = vmul.f32 %v2243_v2, %v2275_v15  ;;  %v3257_v39 = vld [vmem:[#allocation36_spill] sm:$0xff]  ;;  %v2625_v32 = vpop.permute.xlu1 %515  ;;  %v3259_v15 = vld [vmem:[#allocation53_spill] sm:$0xff]  ;;  %v3260_v19 = vld [vmem:[#allocation18_spill] sm:$0xff] }
  0xab   :  { %3254 = vst [vmem:[#allocation58_spill] sm:$0xff] %v2607_v57  ;;  %v378_v47 = vadd.f32 %v346_v41, %v256_v34  ;;  %v380_v50 = vadd.f32 %v348_v62, %v258_v52  ;;  %v222_v58 = vmul.f32 %v2243_v2, %v3255_v42  ;;  %v377_v55 = vadd.f32 %v345_v25, %v255_v48  ;;  %v3258_v52 = vld [vmem:[#allocation52_spill] sm:$0xff] }
  0xac   :  { %v379_v45 = vadd.f32 %v347_v35, %v257_v20  ;;  %v336_v57 = vmul.f32 %v3256_v56, %v2411_v14  ;;  %v344_v59 = vmul.f32 %v3256_v56, %v3257_v39  ;;  %v246_v28 = vadd.f32 %v214_v51, %v3258_v52  ;;  %v3261_v51 = vld [vmem:[#allocation20_spill] sm:$0xff]  ;;  %v3273_v56 = vld [vmem:[#allocation34_spill] sm:$0xff] }
  0xad   :  { %v2627_v60 = vadd.f32 %v467_v49, %v378_v47  ;;  %v2629_v34 = vadd.f32 %v469_v6, %v380_v50  ;;  %v254_v17 = vadd.f32 %v222_v58, %v3259_v15  ;;  %v572_v48 = vmul.f32 %v2246_v3, %v2625_v32 }
  0xae   :  { %v574_v20 = vmul.f32 %v2257_v7, %v2625_v32  ;;  %v571_v14 = vmul.f32 %v2260_v8, %v2625_v32  ;;  %v573_v27 = vmul.f32 %v2263_v9, %v2625_v32  ;;  %v2641_v49 = vadd.f32 %v466_v12, %v377_v55  ;;  %v2659_v12 = vpop.permute.xlu1 %519 }
  0xaf   :  { %v2643_v6 = vadd.f32 %v468_v37, %v379_v45  ;;  %v576_v39 = vmul.f32 %v3260_v19, %v2625_v32  ;;  %v368_v41 = vadd.f32 %v336_v57, %v246_v28  ;;  %v2648_v62 = vadd.f32 %v572_v48, %v2529_v1  ;;  %v3262_v45 = vld [vmem:[#allocation22_spill] sm:$0xff] }
  0xb0   :  { %v2651_v25 = vadd.f32 %v574_v20, %v2531_v22  ;;  %v2654_v35 = vadd.f32 %v571_v14, %v2533_v40  ;;  %v2657_v47 = vadd.f32 %v573_v27, %v2535_v26  ;;  %v376_v50 = vadd.f32 %v344_v59, %v254_v17  ;;  %v3263_v27 = vld [vmem:[#allocation28_spill] sm:$0xff] }
  0xb1   :  { %v2661_v37 = vadd.f32 %v576_v39, %v487_v54  ;;  %v457_v57 = vmul.f32 %v3261_v51, %v2497_v18  ;;  %v465_v1 = vmul.f32 %v3261_v51, %v2551_v38  ;;  %v580_v22 = vmul.f32 %v2246_v3, %v2659_v12  ;;  %v3264_v39 = vld [vmem:[#allocation26_spill] sm:$0xff] }
  0xb2   :  { %v582_v40 = vmul.f32 %v2257_v7, %v2659_v12  ;;  %v579_v26 = vmul.f32 %v2260_v8, %v2659_v12  ;;  %v581_v54 = vmul.f32 %v2263_v9, %v2659_v12  ;;  %v584_v42 = vmul.f32 %v3260_v19, %v2659_v12 }
  0xb3   :  { %v489_v58 = vadd.f32 %v457_v57, %v368_v41  ;;  %v497_v55 = vadd.f32 %v465_v1, %v376_v50  ;;  %v578_v59 = vmul.f32 %v3262_v45, %v2625_v32  ;;  %v2679_v52 = vadd.f32 %v580_v22, %v491_v23  ;;  %v2695_v50 = vpop.permute.xlu1 %406  ;;  %v3265_v23 = vld [vmem:[#allocation33_spill] sm:$0xff]  ;;  %v3266_v57 = vld [vmem:[#allocation31_spill] sm:$0xff] }
  0xb4   :  { %v2681_v28 = vadd.f32 %v582_v40, %v493_v11  ;;  %v2683_v15 = vadd.f32 %v579_v26, %v490_v16  ;;  %v2685_v17 = vadd.f32 %v581_v54, %v492_v44  ;;  %v2687_v48 = vadd.f32 %v584_v42, %v495_v43  ;;  %v3267_v16 = vld [vmem:[#allocation21_spill] sm:$0xff]  ;;  %v3268_v43 = vld [vmem:[#allocation23_spill] sm:$0xff] }
  0xb5   :  { %v586_v20 = vmul.f32 %v3262_v45, %v2659_v12  ;;  %v2691_v14 = vadd.f32 %v578_v59, %v489_v58  ;;  %v243_v41 = vadd.f32 %v3264_v39, %v3263_v27  ;;  %v251_v11 = vadd.f32 %v3266_v57, %v3265_v23  ;;  %v3269_v59 = vld [vmem:[#allocation41_spill] sm:$0xff]  ;;  %v3270_v39 = vld [vmem:[#allocation39_spill] sm:$0xff] }
  0xb6   :  { %v454_v1 = vmul.f32 %v3267_v16, %v2497_v18  ;;  %v462_v44 = vmul.f32 %v3267_v16, %v2551_v38  ;;  %v575_v22 = vmul.f32 %v3268_v43, %v2625_v32  ;;  %v475_v40 = vmul.f32 %v2236_v63, %v2695_v50 }
  0xb7   :  { %v477_v26 = vmul.f32 %v2239_v0, %v2695_v50  ;;  %v474_v54 = vmul.f32 %v2249_v4, %v2695_v50  ;;  %v476_v42 = vmul.f32 %v2252_v5, %v2695_v50  ;;  %v2713_v58 = vadd.f32 %v586_v20, %v497_v55  ;;  %v3271_v5 = vld [vmem:[#allocation29_spill] sm:$0xff]  ;;  %v3272_v55 = vld [vmem:[#allocation27_spill] sm:$0xff] }
  0xb8   :  { %v365_v27 = vadd.f32 %v3269_v59, %v243_v41  ;;  %v373_v23 = vadd.f32 %v3270_v39, %v251_v11  ;;  %v583_v57 = vmul.f32 %v3268_v43, %v2659_v12  ;;  %v507_v63 = vadd.f32 %v475_v40, %v2553_v24  ;;  %v3274_v41 = vld [vmem:[#allocation32_spill] sm:$0xff]  ;;  %v2727_v11 = vpop.permute.xlu1 %523 }
  0xb9   :  { %v509_v16 = vadd.f32 %v477_v26, %v2555_v30  ;;  %v506_v0 = vadd.f32 %v474_v54, %v2566_v13  ;;  %v508_v4 = vadd.f32 %v476_v42, %v2589_v33  ;;  %v245_v20 = vadd.f32 %v3272_v55, %v3271_v5  ;;  %v2763_v54 = vpop.permute.xlu0 %651 }
  0xba   :  { %v486_v45 = vadd.f32 %v454_v1, %v365_v27  ;;  %v494_v51 = vadd.f32 %v462_v44, %v373_v23  ;;  %v253_v59 = vadd.f32 %v3274_v41, %v3273_v56  ;;  %v2730_v39 = vadd.f32 %v2579_v53, %v507_v63 }
  0xbb   :  { %v2733_v24 = vadd.f32 %v2583_v29, %v509_v16  ;;  %v2736_v30 = vadd.f32 %v2587_v61, %v506_v0  ;;  %v2739_v13 = vadd.f32 %v2595_v21, %v508_v4  ;;  %v588_v33 = vmul.f32 %v2246_v3, %v2727_v11  ;;  %v3275_v61 = vld [vmem:[#allocation42_spill] sm:$0xff]  ;;  %v3276_v21 = vld [vmem:[#allocation40_spill] sm:$0xff] }
  0xbc   :  { %v590_v56 = vmul.f32 %v2257_v7, %v2727_v11  ;;  %v587_v1 = vmul.f32 %v2260_v8, %v2727_v11  ;;  %v589_v53 = vmul.f32 %v2263_v9, %v2727_v11  ;;  %v2749_v29 = vadd.f32 %v575_v22, %v486_v45  ;;  %v3277_v9 = vld [vmem:[#allocation24_spill] sm:$0xff]  ;;  %v3278_v22 = vld [vmem:[#allocation25_spill] sm:$0xff] }
  0xbd   :  { %v2751_v16 = vadd.f32 %v583_v57, %v494_v51  ;;  %v2754_v44 = vadd.f32 %v3275_v61, %v245_v20  ;;  %v2757_v40 = vadd.f32 %v3276_v21, %v253_v59  ;;  %v620_v3 = vadd.f32 %v588_v33, %v2627_v60 }
  0xbe   :  { %v622_v7 = vadd.f32 %v590_v56, %v2629_v34  ;;  %v619_v26 = vadd.f32 %v587_v1, %v2641_v49  ;;  %v621_v8 = vadd.f32 %v589_v53, %v2643_v6  ;;  %v2767_v51 = vmul.f32 %v3277_v9, %v2497_v18  ;;  %v2781_v34 = vpop.permute.xlu1 %641 }
  0xbf   :  { %v2771_v45 = vmul.f32 %v3277_v9, %v2551_v38  ;;  %v2775_v42 = vmul.f32 %v3278_v22, %v2625_v32  ;;  %v2779_v60 = vmul.f32 %v3278_v22, %v2659_v12  ;;  %v676_v49 = vadd.f32 %v2763_v54, %v620_v3 }
  0xc0   :  { %v678_v6 = vadd.f32 %v2763_v54, %v622_v7  ;;  %v2786_v18 = vadd.f32 %v2763_v54, %v619_v26  ;;  %v2789_v38 = vadd.f32 %v2763_v54, %v621_v8  ;;  %v660_v32 = vadd.f32 %v2781_v34, %v2648_v62 }
  0xc1   :  { %v662_v27 = vadd.f32 %v2781_v34, %v2651_v25  ;;  %v659_v12 = vadd.f32 %v2781_v34, %v2654_v35  ;;  %v661_v23 = vadd.f32 %v2781_v34, %v2657_v47  ;;  %vm708_vm0 = vcmp.gt.f32.partialorder %v676_v49, 0.0 }
  0xc2   :  { %v740_v57 = vmul.f32 0.2, %v676_v49  ;;  %vm710_vm1 = vcmp.gt.f32.partialorder %v678_v6, 0.0  ;;  %v742_v63 = vmul.f32 0.2, %v678_v6  ;;  %vm692_vm2 = vcmp.gt.f32.partialorder %v660_v32, 0.0  ;;  %v2799_v5 = vpop.permute.xlu1 %646 }
  0xc3   :  { %v724_v0 = vmul.f32 0.2, %v660_v32  ;;  %vm694_vm3 = vcmp.gt.f32.partialorder %v662_v27, 0.0  ;;  %v726_v4 = vmul.f32 0.2, %v662_v27  ;;  %vm691_vm4 = vcmp.gt.f32.partialorder %v659_v12, 0.0 }
  0xc4   :  { %v723_v62 = vmul.f32 0.2, %v659_v12  ;;  %vm693_vm5 = vcmp.gt.f32.partialorder %v661_v23, 0.0  ;;  %v725_v25 = vmul.f32 0.2, %v661_v23  ;;  %v668_v35 = vadd.f32 %v2799_v5, %v2679_v52 }
  0xc5   :  { %v756_v55 = vsel %vm692_vm2, %v660_v32, %v724_v0  ;;  %v670_v47 = vadd.f32 %v2799_v5, %v2681_v28  ;;  %v758_v20 = vsel %vm694_vm3, %v662_v27, %v726_v4  ;;  %v667_v41 = vadd.f32 %v2799_v5, %v2683_v15 }
  0xc6   :  { %v755_v59 = vsel %vm691_vm4, %v659_v12, %v723_v62  ;;  %v669_v33 = vadd.f32 %v2799_v5, %v2685_v17  ;;  %v757_v56 = vsel %vm693_vm5, %v661_v23, %v725_v25  ;;  %vm700_vm6 = vcmp.gt.f32.partialorder %v668_v35, 0.0  ;;  %v2809_v61 = vpop.permute.xlu1 %656 }
  0xc7   :  { %v732_v1 = vmul.f32 0.2, %v668_v35  ;;  %vm702_vm7 = vcmp.gt.f32.partialorder %v670_v47, 0.0  ;;  %v734_v53 = vmul.f32 0.2, %v670_v47  ;;  %vm699_vm8 = vcmp.gt.f32.partialorder %v667_v41, 0.0 }
  0xc8   :  { %v731_v52 = vmul.f32 0.2, %v667_v41  ;;  %vm701_vm9 = vcmp.gt.f32.partialorder %v669_v33, 0.0  ;;  %v733_v21 = vmul.f32 0.2, %v669_v33  ;;  %v684_v15 = vadd.f32 %v2809_v61, %v2730_v39 }
  0xc9   :  { %v764_v28 = vsel %vm700_vm6, %v668_v35, %v732_v1  ;;  %v766_v3 = vsel %vm702_vm7, %v670_v47, %v734_v53  ;;  %v772_v7 = vsel %vm708_vm0, %v676_v49, %v740_v57  ;;  %v686_v0 = vadd.f32 %v2809_v61, %v2733_v24 }
  0xca   :  { %v1868_v26 = vpack.c.bf16 %v764_v28, %v756_v55  ;;  %v1876_v17 = vpack.c.bf16 %v766_v3, %v758_v20  ;;  %v763_v8 = vsel %vm699_vm8, %v667_v41, %v731_v52  ;;  %v765_v32 = vsel %vm701_vm9, %v669_v33, %v733_v21 }
  0xcb   :  { %v1870_v27 = vpack.c.bf16 %v763_v8, %v755_v59  ;;  %v1878_v12 = vpack.c.bf16 %v765_v32, %v757_v56  ;;  %vm716_vm10 = vcmp.gt.f32.partialorder %v684_v15, 0.0  ;;  %v748_v23 = vmul.f32 0.2, %v684_v15 }
  0xcc   :  { %1869 = vmatprep.subr.bf16.mxu0 %v1868_v26  ;;  %1877 = vmatprep.subr.bf16.mxu1 %v1876_v17  ;;  %v774_v4 = vsel %vm710_vm1, %v678_v6, %v742_v63  ;;  %v683_v39 = vadd.f32 %v2809_v61, %v2736_v30  ;;  %vm707_vm11 = vcmp.gt.f32.partialorder %v2786_v18, 0.0  ;;  %v739_v57 = vmul.f32 0.2, %v2786_v18 }
  0xcd   :  { %1871 = vmatpush1.bf16.msra.mxu0 %v1870_v27  ;;  %1879 = vmatpush1.bf16.msra.mxu1 %v1878_v12  ;;  %v780_v49 = vsel %vm716_vm10, %v684_v15, %v748_v23  ;;  %v685_v62 = vadd.f32 %v2809_v61, %v2739_v13  ;;  %vm709_vm13 = vcmp.gt.f32.partialorder %v2789_v38, 0.0  ;;  %vm718_vm14 = vcmp.gt.f32.partialorder %v686_v0, 0.0  ;;  %v3279_v27 = vld [vmem:[#allocation43_spill] sm:$0xff]  ;;  %v3280_v12 = vld [vmem:[#allocation14_spill] sm:$0xff] }
  0xce   :  { %v1872_v25 = vpack.c.bf16 %v780_v49, %v772_v7  ;;  %v750_v24 = vmul.f32 0.2, %v686_v0  ;;  %vm715_vm15 = vcmp.gt.f32.partialorder %v683_v39, 0.0  ;;  %v747_v6 = vmul.f32 0.2, %v683_v39  ;;  %v3281_v49 = vld [vmem:[#allocation35_spill] sm:$0xff] }
  0xcf   :  { %v771_v30 = vsel %vm707_vm11, %v2786_v18, %v739_v57  ;;  %vm717_vm0 = vcmp.gt.f32.partialorder %v685_v62, 0.0  ;;  %v741_v63 = vmul.f32 0.2, %v2789_v38  ;;  %v749_v55 = vmul.f32 0.2, %v685_v62 }
  0xd0   :  { %1873 = vmatprep.subr.bf16.mxu0 %v1872_v25  ;;  %v782_v35 = vsel %vm718_vm14, %v686_v0, %v750_v24  ;;  %v664_v47 = vadd.f32 %v2781_v34, %v2661_v37  ;;  %v672_v13 = vadd.f32 %v2799_v5, %v2687_v48  ;;  %v779_v41 = vsel %vm715_vm15, %v683_v39, %v747_v6  ;;  %v3283_v25 = vld [vmem:[#allocation49_spill] sm:$0xff]  ;;  %v3284_v24 = vld [vmem:[#allocation15_spill] sm:$0xff] }
  0xd1   :  { %v1880_v20 = vpack.c.bf16 %v782_v35, %v774_v4  ;;  %v773_v59 = vsel %vm709_vm13, %v2789_v38, %v741_v63  ;;  %v666_v18 = vadd.f32 %v2781_v34, %v2691_v14  ;;  %v1874_v33 = vpack.c.bf16 %v779_v41, %v771_v30  ;;  %v2840_v38 = vld [vmem:[%s3159_s5] sm:$0xff]  ;;  %v3285_v30 = vld [vmem:[#allocation17_spill] sm:$0xff]  ;;  %v3286_v35 = vld [vmem:[#allocation46_spill] sm:$0xff] }
  0xd2   :  { %v781_v56 = vsel %vm717_vm0, %v685_v62, %v749_v55  ;;  %vm696_vm1 = vcmp.gt.f32.partialorder %v664_v47, 0.0  ;;  %vm704_vm2 = vcmp.gt.f32.partialorder %v672_v13, 0.0  ;;  %v728_v53 = vmul.f32 0.2, %v664_v47 }
  0xd3   :  { %1881 = vmatprep.subr.bf16.mxu1 %v1880_v20  ;;  %v1882_v1 = vpack.c.bf16 %v781_v56, %v773_v59  ;;  %v736_v37 = vmul.f32 0.2, %v672_v13  ;;  %v674_v48 = vadd.f32 %v2799_v5, %v2713_v58  ;;  %1875 = vmatpush1.bf16.msra.mxu0 %v1874_v33  ;;  %vm698_vm3 = vcmp.gt.f32.partialorder %v666_v18, 0.0 }
  0xd4   :  { %v730_v52 = vmul.f32 0.2, %v666_v18  ;;  %v663_v14 = vadd.f32 %v2781_v34, %v2749_v29  ;;  %v671_v21 = vadd.f32 %v2799_v5, %v2751_v16  ;;  %v760_v28 = vsel %vm696_vm1, %v664_v47, %v728_v53  ;;  %v3288_v53 = vld [vmem:[#allocation16_spill] sm:$0xff] }
  0xd5   :  { %1883 = vmatpush1.bf16.msra.mxu1 %v1882_v1  ;;  %v768_v3 = vsel %vm704_vm2, %v672_v13, %v736_v37  ;;  %vm706_vm4 = vcmp.gt.f32.partialorder %v674_v48, 0.0  ;;  %v738_v15 = vmul.f32 0.2, %v674_v48  ;;  %v488_v29 = vadd.f32 %v2767_v51, %v2754_v44 }
  0xd6   :  { %v1884_v58 = vpack.c.bf16 %v768_v3, %v760_v28  ;;  %v762_v7 = vsel %vm698_vm3, %v666_v18, %v730_v52  ;;  %vm695_vm5 = vcmp.gt.f32.partialorder %v663_v14, 0.0  ;;  %vm703_vm6 = vcmp.gt.f32.partialorder %v671_v21, 0.0  ;;  %1852 = vmatmul.mubr.msk.f32.vlgmr.msra.gmra.mrb[0].mxu0 %vm815_vm12, %v2840_v38  ;;  %v3287_v18 = vld [vmem:[#allocation56_spill] sm:$0xff] }
  0xd7   :  { %v770_v26 = vsel %vm706_vm4, %v674_v48, %v738_v15  ;;  %v727_v17 = vmul.f32 0.2, %v663_v14  ;;  %v735_v8 = vmul.f32 0.2, %v671_v21  ;;  %v496_v32 = vadd.f32 %v2771_v45, %v2757_v40  ;;  %v2868_v45 = vld [vmem:[%s3159_s5 + $0x8] sm:$0xff] }
  0xd8   :  { %1885 = vmatprep.subr.bf16.mxu0 %v1884_v58  ;;  %v1892_v16 = vpack.c.bf16 %v770_v26, %v762_v7  ;;  %1856 = vmatmul.mubr.msk.f32.vlgmr.msra.gmra.mrb[0].mxu1 %vm815_vm12, %v2840_v38  ;;  %v139_v23 = vmul.f32 %v3280_v12, %v3279_v27  ;;  %v609_v39 = vadd.f32 %v2775_v42, %v488_v29  ;;  %v3282_v62 = vmov 0.0   ;;  %v3289_v7 = vld [vmem:[#allocation19_spill] sm:$0xff] }
  0xd9   :  { %v759_v0 = vsel %vm695_vm5, %v663_v14, %v727_v17  ;;  %v767_v4 = vsel %vm703_vm6, %v671_v21, %v735_v8  ;;  %v147_v57 = vmul.f32 %v3280_v12, %v3281_v49  ;;  %898 = vmatprep.mubr.f32.mxu0 %v3282_v62  ;;  %v617_v51 = vadd.f32 %v2779_v60, %v496_v32  ;;  %v3290_v32 = vld [vmem:[#allocation20_spill] sm:$0xff] }
  0xda   :  { %1893 = vmatprep.subr.bf16.mxu1 %v1892_v16  ;;  %v1886_v44 = vpack.c.bf16 %v767_v4, %v759_v0  ;;  %v228_v6 = vmul.f32 %v3284_v24, %v3283_v25  ;;  %v236_v40 = vmul.f32 %v3284_v24, %v2507_v46  ;;  %v665_v42 = vadd.f32 %v2781_v34, %v609_v39  ;;  %v2923_v0 = vld [vmem:[%s3159_s5 + $0x18] sm:$0xff]  ;;  %v3294_v24 = vld [vmem:[#allocation37_spill] sm:$0xff] }
  0xdb   :  { %v350_v63 = vmul.f32 %v3285_v30, %v2591_v31  ;;  %v358_v55 = vmul.f32 %v3285_v30, %v3286_v35  ;;  %v471_v60 = vmul.f32 %v2265_v10, %v2537_v36  ;;  %987 = vmatprep.mubr.f32.mxu1 %v3282_v62  ;;  %v673_v47 = vadd.f32 %v2799_v5, %v617_v51 }
  0xdc   :  { %1887 = vmatpush1.bf16.msra.mxu0 %v1886_v44  ;;  %v260_v13 = vadd.f32 %v228_v6, %v139_v23  ;;  %v268_v20 = vadd.f32 %v236_v40, %v147_v57  ;;  %v479_v41 = vmul.f32 %v2265_v10, %v2695_v50  ;;  %vm697_vm7 = vcmp.gt.f32.partialorder %v665_v42, 0.0  ;;  %1857 = vmatmul.mubr.msk.f32.gmra.mrb[2].mxu1 %vm815_vm12, %v2868_v45  ;;  %v2894_v10 = vld [vmem:[%s3159_s5 + $0x10] sm:$0xff]  ;;  %v3292_v57 = vld [vmem:[#allocation44_spill] sm:$0xff] }
  0xdd   :  { %v729_v34 = vmul.f32 0.2, %v665_v42  ;;  %v592_v59 = vmul.f32 %v3260_v19, %v2727_v11  ;;  %v600_v33 = vmul.f32 %v3260_v19, %v3287_v18  ;;  %1853 = vmatmul.mubr.msk.f32.gmra.mrb[2].mxu0 %vm815_vm12, %v2868_v45  ;;  %vm705_vm8 = vcmp.gt.f32.partialorder %v673_v47, 0.0  ;;  %993 = vmatprep.mubr.f32.mxu1 %v3282_v62  ;;  %v3293_v44 = vld [vmem:[#allocation50_spill] sm:$0xff] }
  0xde   :  { %v737_v5 = vmul.f32 0.2, %v673_v47  ;;  %v382_v56 = vadd.f32 %v350_v63, %v260_v13  ;;  %v390_v1 = vadd.f32 %v358_v55, %v268_v20  ;;  %904 = vmatprep.mubr.f32.mxu0 %v3282_v62  ;;  %v141_v37 = vmul.f32 %v3288_v53, %v3279_v27  ;;  %v3295_v6 = vld [vmem:[#allocation54_spill] sm:$0xff]  ;;  %v3297_v13 = vld [vmem:[#allocation57_spill] sm:$0xff] }
  0xdf   :  { %v761_v19 = vsel %vm697_vm7, %v665_v42, %v729_v34  ;;  %v149_v48 = vmul.f32 %v3288_v53, %v3281_v49  ;;  %v230_v52 = vmul.f32 %v2243_v2, %v3283_v25  ;;  %v238_v3 = vmul.f32 %v2243_v2, %v2507_v46  ;;  %v3296_v42 = vld [vmem:[#allocation21_spill] sm:$0xff] }
  0xe0   :  { %v769_v14 = vsel %vm705_vm8, %v673_v47, %v737_v5  ;;  %v503_v21 = vadd.f32 %v471_v60, %v382_v56  ;;  %v511_v28 = vadd.f32 %v479_v41, %v390_v1  ;;  %v352_v26 = vmul.f32 %v3289_v7, %v2591_v31  ;;  %1858 = vmatmul.mubr.msk.f32.gmra.mrb[4].mxu1 %vm815_vm12, %v2894_v10  ;;  %v3291_v31 = vld [vmem:[#allocation22_spill] sm:$0xff]  ;;  %v3298_v41 = vld [vmem:[#allocation47_spill] sm:$0xff] }
  0xe1   :  { %v1894_v15 = vpack.c.bf16 %v769_v14, %v761_v19  ;;  %v262_v58 = vadd.f32 %v230_v52, %v141_v37  ;;  %v360_v17 = vmul.f32 %v3289_v7, %v3286_v35  ;;  %1854 = vmatmul.mubr.msk.f32.gmra.mrb[4].mxu0 %vm815_vm12, %v2894_v10  ;;  %v270_v16 = vadd.f32 %v238_v3, %v149_v48  ;;  %v3299_v52 = vld [vmem:[#allocation45_spill] sm:$0xff]  ;;  %v3300_v14 = vld [vmem:[#allocation51_spill] sm:$0xff] }
  0xe2   :  { %v624_v8 = vadd.f32 %v592_v59, %v503_v21  ;;  %v632_v29 = vadd.f32 %v600_v33, %v511_v28  ;;  %v473_v27 = vmul.f32 %v3290_v32, %v2537_v36  ;;  %v481_v46 = vmul.f32 %v3290_v32, %v2695_v50  ;;  %910 = vmatprep.mubr.f32.mxu0 %v3282_v62  ;;  %v3301_v28 = vld [vmem:[#allocation38_spill] sm:$0xff]  ;;  %v3302_v3 = vld [vmem:[#allocation55_spill] sm:$0xff] }
  0xe3   :  { %1895 = vmatpush1.bf16.msra.mxu1 %v1894_v15  ;;  %v384_v2 = vadd.f32 %v352_v26, %v262_v58  ;;  %v594_v12 = vmul.f32 %v3291_v31, %v2727_v11  ;;  %v602_v23 = vmul.f32 %v3291_v31, %v3287_v18  ;;  %v392_v49 = vadd.f32 %v360_v17, %v270_v16  ;;  %v3304_v16 = vld [vmem:[#allocation48_spill] sm:$0xff] }
  0xe4   :  { %v680_v4 = vadd.f32 %v2763_v54, %v624_v8  ;;  %v688_v39 = vadd.f32 %v2809_v61, %v632_v29  ;;  %v259_v51 = vadd.f32 %v3293_v44, %v3292_v57  ;;  %v267_v40 = vadd.f32 %v3295_v6, %v3294_v24  ;;  %999 = vmatprep.mubr.f32.mxu1 %v3282_v62  ;;  %v3303_v8 = vld [vmem:[#allocation58_spill] sm:$0xff] }
  0xe5   :  { %v505_v25 = vadd.f32 %v473_v27, %v384_v2  ;;  %v470_v30 = vmul.f32 %v3296_v42, %v2537_v36  ;;  %v478_v63 = vmul.f32 %v3296_v42, %v2695_v50  ;;  %1855 = vmatmul.mubr.msk.f32.gmra.mrb[6].mxu0 %vm815_vm12, %v2923_v0  ;;  %1859 = vmatmul.mubr.msk.f32.gmra.mrb[6].mxu1 %vm815_vm12, %v2923_v0 }
  0xe6   :  { %vm712_vm9 = vcmp.gt.f32.partialorder %v680_v4, 0.0  ;;  %vm720_vm10 = vcmp.gt.f32.partialorder %v688_v39, 0.0  ;;  %v744_v35 = vmul.f32 0.2, %v680_v4  ;;  %v752_v55 = vmul.f32 0.2, %v688_v39  ;;  %1070 = vmatprep.mubr.f32.mxu0 %v3282_v62  ;;  %1159 = vmatprep.mubr.f32.mxu1 %v3282_v62 }
  0xe7   :  { %v513_v60 = vadd.f32 %v481_v46, %v392_v49  ;;  %v626_v47 = vadd.f32 %v594_v12, %v505_v25  ;;  %v381_v20 = vadd.f32 %v3297_v13, %v259_v51  ;;  %v389_v34 = vadd.f32 %v3298_v41, %v267_v40 }
  0xe8   :  { %v776_v59 = vsel %vm712_vm9, %v680_v4, %v744_v35  ;;  %v784_v33 = vsel %vm720_vm10, %v688_v39, %v752_v55  ;;  %v591_v5 = vmul.f32 %v3268_v43, %v2727_v11  ;;  %v599_v56 = vmul.f32 %v3268_v43, %v3287_v18 }
  0xe9   :  { %v1888_v1 = vpack.c.bf16 %v784_v33, %v776_v59  ;;  %v634_v19 = vadd.f32 %v602_v23, %v513_v60  ;;  %v682_v53 = vadd.f32 %v2763_v54, %v626_v47  ;;  %v502_v37 = vadd.f32 %v470_v30, %v381_v20 }
  0xea   :  { %v510_v48 = vadd.f32 %v478_v63, %v389_v34  ;;  %v261_v21 = vadd.f32 %v3300_v14, %v3299_v52  ;;  %v269_v15 = vadd.f32 %v3302_v3, %v3301_v28  ;;  %v472_v58 = vmul.f32 %v3277_v9, %v2537_v36 }
  0xeb   :  { %1889 = vmatprep.subr.bf16.mxu0 %v1888_v1  ;;  %v690_v43 = vadd.f32 %v2809_v61, %v634_v19  ;;  %vm714_vm11 = vcmp.gt.f32.partialorder %v682_v53, 0.0  ;;  %v746_v7 = vmul.f32 0.2, %v682_v53  ;;  %v623_v26 = vadd.f32 %v591_v5, %v502_v37 }
  0xec   :  { %v631_v17 = vadd.f32 %v599_v56, %v510_v48  ;;  %v383_v29 = vadd.f32 %v3303_v8, %v261_v21  ;;  %v391_v32 = vadd.f32 %v3304_v16, %v269_v15  ;;  %v480_v27 = vmul.f32 %v3277_v9, %v2695_v50 }
  0xed   :  { %vm722_vm13 = vcmp.gt.f32.partialorder %v690_v43, 0.0  ;;  %v754_v2 = vmul.f32 0.2, %v690_v43  ;;  %v778_v46 = vsel %vm714_vm11, %v682_v53, %v746_v7  ;;  %v679_v31 = vadd.f32 %v2763_v54, %v623_v26 }
  0xee   :  { %v687_v36 = vadd.f32 %v2809_v61, %v631_v17  ;;  %v504_v12 = vadd.f32 %v472_v58, %v383_v29  ;;  %v512_v23 = vadd.f32 %v480_v27, %v391_v32  ;;  %v593_v4 = vmul.f32 %v3278_v22, %v2727_v11 }
  0xef   :  { %v786_v39 = vsel %vm722_vm13, %v690_v43, %v754_v2  ;;  %vm711_vm14 = vcmp.gt.f32.partialorder %v679_v31, 0.0  ;;  %v743_v49 = vmul.f32 0.2, %v679_v31  ;;  %v601_v57 = vmul.f32 %v3278_v22, %v3287_v18 }
  0xf0   :  { %v1896_v44 = vpack.c.bf16 %v786_v39, %v778_v46  ;;  %vm719_vm15 = vcmp.gt.f32.partialorder %v687_v36, 0.0  ;;  %v751_v50 = vmul.f32 0.2, %v687_v36  ;;  %v625_v9 = vadd.f32 %v593_v4, %v504_v12 }
  0xf1   :  { %v633_v51 = vadd.f32 %v601_v57, %v512_v23  ;;  %v775_v25 = vsel %vm711_vm14, %v679_v31, %v743_v49 }
  0xf2   :  { %1897 = vmatprep.subr.bf16.mxu1 %v1896_v44  ;;  %v783_v24 = vsel %vm719_vm15, %v687_v36, %v751_v50  ;;  %v681_v6 = vadd.f32 %v2763_v54, %v625_v9  ;;  %v2991_v54 = vpop.permute.xlu1 %797 }
  0xf3   :  { %v1890_v40 = vpack.c.bf16 %v783_v24, %v775_v25  ;;  %v689_v42 = vadd.f32 %v2809_v61, %v633_v51  ;;  %v2993_v61 = vpop.permute.xlu0 %802 }
  0xf4   :  { %vm713_vm0 = vcmp.gt.f32.partialorder %v681_v6, 0.0  ;;  %v745_v11 = vmul.f32 0.2, %v681_v6 }
  0xf5   :  { %1891 = vmatpush1.bf16.msra.mxu0 %v1890_v40  ;;  %vm721_vm1 = vcmp.gt.f32.partialorder %v689_v42, 0.0  ;;  %v753_v30 = vmul.f32 0.2, %v689_v42 }
  0xf6   :  { %v777_v63 = vsel %vm713_vm0, %v681_v6, %v745_v11 }
  0xf7   :  { %v785_v22 = vsel %vm721_vm1, %v689_v42, %v753_v30  ;;  %v3001_v41 = vpop.permute.xlu0 %812 }
  0xf8   :  { %v1898_v18 = vpack.c.bf16 %v785_v22, %v777_v63  ;;  %1860 = vmatmul.mubr.msk.f32.vlgmr.msra.gmra.mrb[8].mxu0 %vm815_vm12, %v2840_v38 }
  0xf9   :  { %1076 = vmatprep.mubr.f32.mxu0 %v3282_v62 }
  0xfa   :  { %1899 = vmatpush1.bf16.msra.mxu1 %v1898_v18 }
  0xfb   :  { %v3012_v17 = vpop.permute.xlu0 %1291 }
  0xfc   :  { %1861 = vmatmul.mubr.msk.f32.gmra.mrb[10].mxu0 %vm815_vm12, %v2868_v45 }
  0xfd   :  { %1864 = vmatmul.mubr.msk.f32.vlgmr.msra.gmra.mrb[8].mxu1 %vm815_vm12, %v2840_v38  ;;  %1082 = vmatprep.mubr.f32.mxu0 %v3282_v62  ;;  %v2995_v38 = vpop.permute.xlu1 %807 }
  0xfe   :  { %1165 = vmatprep.mubr.f32.mxu1 %v3282_v62 }
 0x100   :  { %1862 = vmatmul.mubr.msk.f32.gmra.mrb[12].mxu0 %vm815_vm12, %v2894_v10 }
 0x101   :  { %1865 = vmatmul.mubr.msk.f32.gmra.mrb[10].mxu1 %vm815_vm12, %v2868_v45  ;;  %1088 = vmatprep.mubr.f32.mxu0 %v3282_v62  ;;  %v3003_v33 = vpop.permute.xlu1 %1286 }
 0x102   :  { %1171 = vmatprep.mubr.f32.mxu1 %v3282_v62 }
 0x104   :  { %1863 = vmatmul.mubr.msk.f32.gmra.mrb[14].mxu0 %vm815_vm12, %v2923_v0 }
 0x105   :  { %1866 = vmatmul.mubr.msk.f32.gmra.mrb[12].mxu1 %vm815_vm12, %v2894_v10  ;;  %v3020_v9 = vpop.permute.xlu1 %1296 }
 0x106   :  { %1177 = vmatprep.mubr.f32.mxu1 %v3282_v62 }
 0x109   :  { %1867 = vmatmul.mubr.msk.f32.gmra.mrb[14].mxu1 %vm815_vm12, %v2923_v0 }
 0x1a9   :  { %v894_v45 = vpop.f32.mrb[0].mxu0 }
 0x1aa   :  { %v895_v35 = vadd.f32 %v894_v45, %v2991_v54  ;;  %v896_v60 = vpop.f32.mrb[1].mxu0 }
 0x1ab   :  { %v983_v55 = vpop.f32.mrb[0].mxu1  ;;  %v897_v10 = vadd.f32 %v896_v60, %v2991_v54 }
 0x1ac   :  { %v984_v47 = vadd.f32 %v983_v55, %v2991_v54  ;;  %v985_v13 = vpop.f32.mrb[1].mxu1  ;;  %vm1184_vm2 = vcmp.gt.f32.partialorder %v895_v35, 0.0  ;;  %v1216_v20 = vmul.f32 0.2, %v895_v35 }
 0x1ad   :  { %v986_v0 = vadd.f32 %v985_v13, %v2991_v54  ;;  %vm1185_vm3 = vcmp.gt.f32.partialorder %v897_v10, 0.0  ;;  %v1217_v59 = vmul.f32 0.2, %v897_v10 }
 0x1ae   :  { %vm1186_vm12 = vcmp.gt.f32.partialorder %v984_v47, 0.0  ;;  %v1218_v34 = vmul.f32 0.2, %v984_v47  ;;  %v1248_v5 = vsel %vm1184_vm2, %v895_v35, %v1216_v20 }
 0x1af   :  { %vm1187_vm4 = vcmp.gt.f32.partialorder %v986_v0, 0.0  ;;  %v1219_v56 = vmul.f32 0.2, %v986_v0  ;;  %v1249_v19 = vsel %vm1185_vm3, %v897_v10, %v1217_v59  ;;  %v989_v37 = vpop.f32.mrb[2].mxu1  ;;  %v1304_v48 = vmul.f32 %v3003_v33, %v1248_v5 }
 0x1b0   :  { %v1250_v1 = vsel %vm1186_vm12, %v984_v47, %v1218_v34  ;;  %v900_v53 = vpop.f32.mrb[2].mxu0  ;;  %v991_v21 = vpop.f32.mrb[3].mxu1  ;;  %v990_v3 = vadd.f32 %v989_v37, %v2993_v61  ;;  %v1305_v7 = vmul.f32 %v3003_v33, %v1249_v19 }
 0x1b1   :  { %v901_v52 = vadd.f32 %v900_v53, %v2993_v61  ;;  %v902_v14 = vpop.f32.mrb[3].mxu0  ;;  %v1251_v28 = vsel %vm1187_vm4, %v986_v0, %v1219_v56  ;;  %v992_v58 = vadd.f32 %v991_v21, %v2993_v61  ;;  %v1306_v43 = vmul.f32 %v3003_v33, %v1250_v1  ;;  %v3029_v53 = vpop.permute.xlu0 %1301 }
 0x1b2   :  { %v903_v15 = vadd.f32 %v902_v14, %v2993_v61  ;;  %vm1194_vm6 = vcmp.gt.f32.partialorder %v990_v3, 0.0  ;;  %v1226_v8 = vmul.f32 0.2, %v990_v3  ;;  %v1307_v16 = vmul.f32 %v3003_v33, %v1251_v28 }
 0x1b3   :  { %vm1192_vm5 = vcmp.gt.f32.partialorder %v901_v52, 0.0  ;;  %v1224_v26 = vmul.f32 0.2, %v901_v52  ;;  %vm1195_vm8 = vcmp.gt.f32.partialorder %v992_v58, 0.0  ;;  %v1227_v27 = vmul.f32 0.2, %v992_v58 }
 0x1b4   :  { %vm1193_vm7 = vcmp.gt.f32.partialorder %v903_v15, 0.0  ;;  %v1225_v29 = vmul.f32 0.2, %v903_v15  ;;  %v906_v2 = vpop.f32.mrb[4].mxu0  ;;  %v995_v46 = vpop.f32.mrb[4].mxu1  ;;  %v1258_v36 = vsel %vm1194_vm6, %v990_v3, %v1226_v8 }
 0x1b5   :  { %v1256_v32 = vsel %vm1192_vm5, %v901_v52, %v1224_v26  ;;  %v907_v23 = vadd.f32 %v906_v2, %v2995_v38  ;;  %v908_v4 = vpop.f32.mrb[5].mxu0  ;;  %v997_v39 = vpop.f32.mrb[5].mxu1  ;;  %v1314_v49 = vmul.f32 %v3012_v17, %v1258_v36  ;;  %v1259_v44 = vsel %vm1195_vm8, %v992_v58, %v1227_v27 }
 0x1b6   :  { %v1312_v31 = vmul.f32 %v3012_v17, %v1256_v32  ;;  %v1257_v12 = vsel %vm1193_vm7, %v903_v15, %v1225_v29  ;;  %v996_v50 = vadd.f32 %v995_v46, %v2995_v38  ;;  %v1315_v25 = vmul.f32 %v3012_v17, %v1259_v44 }
 0x1b7   :  { %v1313_v57 = vmul.f32 %v3012_v17, %v1257_v12  ;;  %vm1200_vm9 = vcmp.gt.f32.partialorder %v907_v23, 0.0  ;;  %v1232_v24 = vmul.f32 0.2, %v907_v23  ;;  %v1354_v6 = vadd.f32 %v1314_v49, %v1306_v43 }
 0x1b8   :  { %v1336_v51 = vadd.f32 %v1312_v31, %v1304_v48  ;;  %vm1202_vm10 = vcmp.gt.f32.partialorder %v996_v50, 0.0  ;;  %v1234_v42 = vmul.f32 0.2, %v996_v50  ;;  %v912_v11 = vpop.f32.mrb[6].mxu0  ;;  %v1001_v30 = vpop.f32.mrb[6].mxu1  ;;  %v1363_v63 = vadd.f32 %v1315_v25, %v1307_v16 }
 0x1b9   :  { %v1345_v40 = vadd.f32 %v1313_v57, %v1305_v7  ;;  %v1264_v22 = vsel %vm1200_vm9, %v907_v23, %v1232_v24  ;;  %v909_v18 = vadd.f32 %v908_v4, %v2995_v38  ;;  %v998_v45 = vadd.f32 %v997_v39, %v2995_v38  ;;  %v914_v35 = vpop.f32.mrb[7].mxu0  ;;  %v1003_v55 = vpop.f32.mrb[7].mxu1 }
 0x1ba   :  { %v1320_v60 = vmul.f32 %v3020_v9, %v1264_v22  ;;  %v1266_v47 = vsel %vm1202_vm10, %v996_v50, %v1234_v42  ;;  %v913_v10 = vadd.f32 %v912_v11, %v3001_v41  ;;  %v1002_v13 = vadd.f32 %v1001_v30, %v3001_v41 }
 0x1bb   :  { %v1322_v20 = vmul.f32 %v3020_v9, %v1266_v47  ;;  %vm1201_vm11 = vcmp.gt.f32.partialorder %v909_v18, 0.0  ;;  %v1233_v0 = vmul.f32 0.2, %v909_v18  ;;  %vm1203_vm13 = vcmp.gt.f32.partialorder %v998_v45, 0.0 }
 0x1bc   :  { %v1337_v34 = vadd.f32 %v1336_v51, %v1320_v60  ;;  %v1235_v59 = vmul.f32 0.2, %v998_v45  ;;  %vm1208_vm14 = vcmp.gt.f32.partialorder %v913_v10, 0.0  ;;  %v1240_v5 = vmul.f32 0.2, %v913_v10  ;;  %v1412_v51 = vpop.permute.xlu1 %1411 }
 0x1bd   :  { %v1355_v56 = vadd.f32 %v1354_v6, %v1322_v20  ;;  %v1265_v1 = vsel %vm1201_vm11, %v909_v18, %v1233_v0  ;;  %vm1210_vm15 = vcmp.gt.f32.partialorder %v1002_v13, 0.0  ;;  %v1242_v19 = vmul.f32 0.2, %v1002_v13  ;;  %v3305_v18 = vld [vmem:[#allocation12_spill] sm:$0xff] }
 0x1be   :  { %v1321_v37 = vmul.f32 %v3020_v9, %v1265_v1  ;;  %v1267_v48 = vsel %vm1203_vm13, %v998_v45, %v1235_v59  ;;  %v1272_v52 = vsel %vm1208_vm14, %v913_v10, %v1240_v5  ;;  %v915_v14 = vadd.f32 %v914_v35, %v3001_v41 }
 0x1bf   :  { %v1323_v21 = vmul.f32 %v3020_v9, %v1267_v48  ;;  %v1328_v28 = vmul.f32 %v3029_v53, %v1272_v52  ;;  %v1274_v3 = vsel %vm1210_vm15, %v1002_v13, %v1242_v19  ;;  %v1004_v15 = vadd.f32 %v1003_v55, %v3001_v41 }
 0x1c0   :  { %v1346_v58 = vadd.f32 %v1345_v40, %v1321_v37  ;;  %v1330_v43 = vmul.f32 %v3029_v53, %v1274_v3  ;;  %vm1209_vm0 = vcmp.gt.f32.partialorder %v915_v14, 0.0  ;;  %v1241_v7 = vmul.f32 0.2, %v915_v14 }
 0x1c1   :  { %v1364_v26 = vadd.f32 %v1363_v63, %v1323_v21  ;;  %v1338_v8 = vadd.f32 %v1337_v34, %v1328_v28  ;;  %vm1211_vm1 = vcmp.gt.f32.partialorder %v1004_v15, 0.0  ;;  %v1243_v29 = vmul.f32 0.2, %v1004_v15 }
 0x1c2   :  { %v1356_v16 = vadd.f32 %v1355_v56, %v1330_v43  ;;  %v1273_v32 = vsel %vm1209_vm0, %v915_v14, %v1241_v7  ;;  %v3041_v45 = vrot.slane %v1412_v51, %v3305_v18 }
 0x1c3   :  { %v1339_v27 = vrot.slane %v1338_v8, 4  ;;  %v1329_v2 = vmul.f32 %v3029_v53, %v1273_v32  ;;  %v1275_v46 = vsel %vm1211_vm1, %v1004_v15, %v1243_v29 }
 0x1c4   :  { %v1357_v31 = vrot.slane %v1356_v16, 4  ;;  %v1331_v36 = vmul.f32 %v3029_v53, %v1275_v46 }
 0x1c5   :  { %v1340_v12 = vadd.f32 %v1339_v27, %v1338_v8  ;;  %v1347_v23 = vadd.f32 %v1346_v58, %v1329_v2 }
 0x1c6   :  { %v1358_v4 = vadd.f32 %v1357_v31, %v1356_v16  ;;  %v1365_v39 = vadd.f32 %v1364_v26, %v1331_v36 }
 0x1c7   :  { %v1341_v49 = vrot.slane %v1340_v12, 2  ;;  %v1348_v57 = vrot.slane %v1347_v23, 4 }
 0x1c8   :  { %v1359_v44 = vrot.slane %v1358_v4, 2  ;;  %v1366_v50 = vrot.slane %v1365_v39, 4 }
 0x1c9   :  { %v1342_v25 = vadd.f32 %v1341_v49, %v1340_v12  ;;  %v1349_v24 = vadd.f32 %v1348_v57, %v1347_v23 }
 0x1ca   :  { %v1360_v6 = vadd.f32 %v1359_v44, %v1358_v4  ;;  %v1367_v40 = vadd.f32 %v1366_v50, %v1365_v39 }
 0x1cb   :  { %v1072_v42 = vpop.f32.mrb[8].mxu0  ;;  %v1343_v11 = vrot.slane %v1342_v25, 1  ;;  %v1350_v30 = vrot.slane %v1349_v24, 2 }
 0x1cc   :  { %v1073_v63 = vadd.f32 %v1072_v42, %v2991_v54  ;;  %v1074_v22 = vpop.f32.mrb[9].mxu0  ;;  %v1361_v35 = vrot.slane %v1360_v6, 1  ;;  %v1368_v55 = vrot.slane %v1367_v40, 2 }
 0x1cd   :  { %v1075_v60 = vadd.f32 %v1074_v22, %v2991_v54  ;;  %v1344_v47 = vadd.f32 %v1343_v11, %v1342_v25  ;;  %v1351_v10 = vadd.f32 %v1350_v30, %v1349_v24 }
 0x1ce   :  { %vm1188_vm2 = vcmp.gt.f32.partialorder %v1073_v63, 0.0  ;;  %v1220_v13 = vmul.f32 0.2, %v1073_v63  ;;  %v1362_v20 = vadd.f32 %v1361_v35, %v1360_v6  ;;  %v1369_v0 = vadd.f32 %v1368_v55, %v1367_v40 }
 0x1cf   :  { %vm1189_vm12 = vcmp.gt.f32.partialorder %v1075_v60, 0.0  ;;  %v1221_v34 = vmul.f32 0.2, %v1075_v60  ;;  %v1078_v59 = vpop.f32.mrb[10].mxu0  ;;  %v1418_v5 = vadd.f32 %v3041_v45, %v1344_v47  ;;  %v1352_v56 = vrot.slane %v1351_v10, 1 }
 0x1d0   :  { %v1252_v1 = vsel %vm1188_vm2, %v1073_v63, %v1220_v13  ;;  %v1161_v19 = vpop.f32.mrb[8].mxu1  ;;  %v1079_v37 = vadd.f32 %v1078_v59, %v2993_v61  ;;  %v1080_v48 = vpop.f32.mrb[11].mxu0  ;;  %v1420_v52 = vadd.f32 %v3041_v45, %v1362_v20  ;;  %v1370_v14 = vrot.slane %v1369_v0, 1 }
 0x1d1   :  { %v1308_v21 = vmul.f32 %v3003_v33, %v1252_v1  ;;  %v1162_v28 = vadd.f32 %v1161_v19, %v2991_v54  ;;  %v1163_v3 = vpop.f32.mrb[9].mxu1  ;;  %v1426_v15 = vsub.f32 0.0, %v1418_v5  ;;  %v1353_v58 = vadd.f32 %v1352_v56, %v1351_v10 }
 0x1d2   :  { %v1253_v43 = vsel %vm1189_vm12, %v1075_v60, %v1221_v34  ;;  %v1164_v7 = vadd.f32 %v1163_v3, %v2991_v54  ;;  %v1428_v26 = vsub.f32 0.0, %v1420_v52  ;;  %v1371_v8 = vadd.f32 %v1370_v14, %v1369_v0 }
 0x1d3   :  { %vm1190_vm3 = vcmp.gt.f32.partialorder %v1162_v28, 0.0  ;;  %v1222_v29 = vmul.f32 0.2, %v1162_v28  ;;  %v1084_v16 = vpop.f32.mrb[12].mxu0  ;;  %v1434_v32 = vmul.f32 1.442695, %v1426_v15  ;;  %v1419_v27 = vadd.f32 %v3041_v45, %v1353_v58 }
 0x1d4   :  { %v1309_v2 = vmul.f32 %v3003_v33, %v1253_v43  ;;  %vm1191_vm4 = vcmp.gt.f32.partialorder %v1164_v7, 0.0  ;;  %v1167_v46 = vpop.f32.mrb[10].mxu1  ;;  %v1086_v31 = vpop.f32.mrb[13].mxu0  ;;  %v1438_v36 = vmul.f32 1.442695, %v1428_v26  ;;  %v1421_v12 = vadd.f32 %v3041_v45, %v1371_v8 }
 0x1d5   :  { %v1254_v23 = vsel %vm1190_vm3, %v1162_v28, %v1222_v29  ;;  %v1223_v4 = vmul.f32 0.2, %v1164_v7  ;;  %v1169_v39 = vpop.f32.mrb[11].mxu1  ;;  %1930 = vpow2.f32 %v1434_v32  ;;  %v1427_v54 = vsub.f32 0.0, %v1419_v27 }
 0x1d6   :  { %v1310_v49 = vmul.f32 %v3003_v33, %v1254_v23  ;;  %vm1196_vm5 = vcmp.gt.f32.partialorder %v1079_v37, 0.0  ;;  %1932 = vpow2.f32 %v1438_v36  ;;  %v1429_v57 = vsub.f32 0.0, %v1421_v12 }
 0x1d7   :  { %v1255_v44 = vsel %vm1191_vm4, %v1164_v7, %v1223_v4  ;;  %v1228_v50 = vmul.f32 0.2, %v1079_v37  ;;  %v1090_v51 = vpop.f32.mrb[14].mxu0  ;;  %v1436_v25 = vmul.f32 1.442695, %v1427_v54  ;;  %v1168_v6 = vadd.f32 %v1167_v46, %v2993_v61 }
 0x1d8   :  { %v1311_v24 = vmul.f32 %v3003_v33, %v1255_v44  ;;  %v1081_v40 = vadd.f32 %v1080_v48, %v2993_v61  ;;  %v1173_v42 = vpop.f32.mrb[12].mxu1  ;;  %v3058_v11 = vpop.f32.mrb[15].mxu0  ;;  %v1440_v30 = vmul.f32 1.442695, %v1429_v57  ;;  %v1170_v22 = vadd.f32 %v1169_v39, %v2993_v61 }
 0x1d9   :  { %v1260_v63 = vsel %vm1196_vm5, %v1079_v37, %v1228_v50  ;;  %v1085_v35 = vadd.f32 %v1084_v16, %v2995_v38  ;;  %v1175_v55 = vpop.f32.mrb[13].mxu1  ;;  %1934 = vpow2.f32 %v1436_v25  ;;  %vm1198_vm6 = vcmp.gt.f32.partialorder %v1168_v6, 0.0 }
 0x1da   :  { %v1316_v60 = vmul.f32 %v3012_v17, %v1260_v63  ;;  %v1230_v47 = vmul.f32 0.2, %v1168_v6  ;;  %1936 = vpow2.f32 %v1440_v30  ;;  %vm1197_vm7 = vcmp.gt.f32.partialorder %v1081_v40, 0.0 }
 0x1db   :  { %v1229_v33 = vmul.f32 0.2, %v1081_v40  ;;  %vm1199_vm8 = vcmp.gt.f32.partialorder %v1170_v22, 0.0  ;;  %v1231_v20 = vmul.f32 0.2, %v1170_v22  ;;  %vm1204_vm9 = vcmp.gt.f32.partialorder %v1085_v35, 0.0 }
 0x1dc   :  { %v1372_v10 = vadd.f32 %v1316_v60, %v1308_v21  ;;  %v1262_v13 = vsel %vm1198_vm6, %v1168_v6, %v1230_v47  ;;  %v1179_v0 = vpop.f32.mrb[14].mxu1  ;;  %v1236_v59 = vmul.f32 0.2, %v1085_v35  ;;  %v1174_v5 = vadd.f32 %v1173_v42, %v2995_v38 }
 0x1dd   :  { %v1318_v34 = vmul.f32 %v3012_v17, %v1262_v13  ;;  %v1261_v61 = vsel %vm1197_vm7, %v1081_v40, %v1229_v33  ;;  %v1181_v56 = vpop.f32.mrb[15].mxu1  ;;  %v1263_v19 = vsel %vm1199_vm8, %v1170_v22, %v1231_v20  ;;  %v1087_v37 = vadd.f32 %v1086_v31, %v2995_v38 }
 0x1de   :  { %v1317_v1 = vmul.f32 %v3012_v17, %v1261_v61  ;;  %v1176_v48 = vadd.f32 %v1175_v55, %v2995_v38  ;;  %v1319_v14 = vmul.f32 %v3012_v17, %v1263_v19  ;;  %v1268_v21 = vsel %vm1204_vm9, %v1085_v35, %v1236_v59 }
 0x1df   :  { %v1390_v52 = vadd.f32 %v1318_v34, %v1310_v49  ;;  %vm1206_vm10 = vcmp.gt.f32.partialorder %v1174_v5, 0.0  ;;  %v1931_v28 = vpop.eup %1930  ;;  %v1324_v15 = vmul.f32 %v3020_v9, %v1268_v21  ;;  %v1238_v58 = vmul.f32 0.2, %v1174_v5 }
 0x1e0   :  { %v1381_v3 = vadd.f32 %v1317_v1, %v1309_v2  ;;  %vm1205_vm11 = vcmp.gt.f32.partialorder %v1087_v37, 0.0  ;;  %v1933_v43 = vpop.eup %1932  ;;  %v1450_v7 = vadd.f32 1.0, %v1931_v28  ;;  %v1399_v26 = vadd.f32 %v1319_v14, %v1311_v24 }
 0x1e1   :  { %v1237_v8 = vmul.f32 0.2, %v1087_v37  ;;  %vm1207_vm13 = vcmp.gt.f32.partialorder %v1176_v48, 0.0  ;;  %v1452_v29 = vadd.f32 1.0, %v1933_v43  ;;  %v1373_v16 = vadd.f32 %v1372_v10, %v1324_v15 }
 0x1e2   :  { %v1270_v32 = vsel %vm1206_vm10, %v1174_v5, %v1238_v58  ;;  %v1239_v38 = vmul.f32 0.2, %v1176_v48  ;;  %1938 = vrcp.f32 %v1450_v7  ;;  %v1091_v46 = vadd.f32 %v1090_v51, %v3001_v41 }
 0x1e3   :  { %v1326_v17 = vmul.f32 %v3020_v9, %v1270_v32  ;;  %v1269_v27 = vsel %vm1205_vm11, %v1087_v37, %v1237_v8  ;;  %v1935_v2 = vpop.eup %1934  ;;  %1940 = vrcp.f32 %v1452_v29  ;;  %v1180_v12 = vadd.f32 %v1179_v0, %v3001_v41 }
 0x1e4   :  { %v1325_v31 = vmul.f32 %v3020_v9, %v1269_v27  ;;  %v1271_v36 = vsel %vm1207_vm13, %v1176_v48, %v1239_v38  ;;  %v1937_v23 = vpop.eup %1936  ;;  %v1451_v4 = vadd.f32 1.0, %v1935_v2  ;;  %vm1212_vm14 = vcmp.gt.f32.partialorder %v1091_v46, 0.0 }
 0x1e5   :  { %v1391_v39 = vadd.f32 %v1390_v52, %v1326_v17  ;;  %v1327_v54 = vmul.f32 %v3020_v9, %v1271_v36  ;;  %v1453_v49 = vadd.f32 1.0, %v1937_v23  ;;  %v1244_v44 = vmul.f32 0.2, %v1091_v46  ;;  %v3306_v52 = vld [vmem:[#allocation9_spill] sm:$0xff] }
 0x1e6   :  { %v1382_v57 = vadd.f32 %v1381_v3, %v1325_v31  ;;  %vm1214_vm15 = vcmp.gt.f32.partialorder %v1180_v12, 0.0  ;;  %1942 = vrcp.f32 %v1451_v4  ;;  %v1246_v51 = vmul.f32 0.2, %v1180_v12 }
 0x1e7   :  { %v1400_v50 = vadd.f32 %v1399_v26, %v1327_v54  ;;  %v1093_v25 = vadd.f32 %v3058_v11, %v3001_v41  ;;  %v2048_v24 = vmov 1966171168   ;;  %1944 = vrcp.f32 %v1453_v49 }
 0x1e8   :  { %v1487_v6 = vunpack.c.l.s4 %v2048_v24  ;;  %v1276_v40 = vsel %vm1212_vm14, %v1091_v46, %v1244_v44  ;;  %v1182_v42 = vadd.f32 %v1181_v56, %v3001_v41  ;;  %v1278_v9 = vsel %vm1214_vm15, %v1180_v12, %v1246_v51 }
 0x1e9   :  { %v1332_v30 = vmul.f32 %v3029_v53, %v1276_v40  ;;  %vm1213_vm0 = vcmp.gt.f32.partialorder %v1093_v25, 0.0  ;;  %v1245_v63 = vmul.f32 0.2, %v1093_v25  ;;  %v1334_v22 = vmul.f32 %v3029_v53, %v1278_v9 }
 0x1ea   :  { %vm1215_vm1 = vcmp.gt.f32.partialorder %v1182_v42, 0.0  ;;  %v1247_v35 = vmul.f32 0.2, %v1182_v42  ;;  %v1488_v13 = vunpack.c.0.s8 %v1487_v6  ;;  %vm1789_vm2 = vcmask 1040384  }
 0x1eb   :  { %v1374_v55 = vadd.f32 %v1373_v16, %v1332_v30  ;;  %v1277_v60 = vsel %vm1213_vm0, %v1093_v25, %v1245_v63  ;;  %v1392_v47 = vadd.f32 %v1391_v39, %v1334_v22  ;;  %vm42_vm12 = vcmask 0  }
 0x1ec   :  { %v1333_v11 = vmul.f32 %v3029_v53, %v1277_v60  ;;  %v1279_v33 = vsel %vm1215_vm1, %v1182_v42, %v1247_v35  ;;  %v1939_v10 = vpop.eup %1938  ;;  %v3083_v14 = vsub.s32 %v1488_v13, %v3306_v52  ;;  %43 = vst.msk [vmem:[#allocation3] sm:$0x1] %vm42_vm12, %v3282_v62 }
 0x1ed   :  { %v1375_v20 = vrot.slane %v1374_v55, 4  ;;  %v1335_v41 = vmul.f32 %v3029_v53, %v1279_v33  ;;  %v1941_v0 = vpop.eup %1940  ;;  %v1393_v34 = vrot.slane %v1392_v47, 4  ;;  %1946 = vlog2.f32 %v1939_v10 }
 0x1ee   :  { %v1383_v61 = vadd.f32 %v1382_v57, %v1333_v11  ;;  %v1559_v59 = vsub.f32 1.0, %v1939_v10  ;;  %1948 = vlog2.f32 %v1941_v0  ;;  %v1561_v1 = vsub.f32 1.0, %v1941_v0 }
 0x1ef   :  { %v1376_v5 = vadd.f32 %v1375_v20, %v1374_v55  ;;  %v1401_v56 = vadd.f32 %v1400_v50, %v1335_v41  ;;  %v1394_v19 = vadd.f32 %v1393_v34, %v1392_v47 }
 0x1f0   :  { %v1384_v37 = vrot.slane %v1383_v61, 4  ;;  %1950 = vlog2.f32 %v1559_v59  ;;  %v1943_v48 = vpop.eup %1942 }
 0x1f1   :  { %v1377_v21 = vrot.slane %v1376_v5, 2  ;;  %v1402_v28 = vrot.slane %v1401_v56, 4  ;;  %1952 = vlog2.f32 %v1561_v1  ;;  %v1945_v53 = vpop.eup %1944  ;;  %v1395_v3 = vrot.slane %v1394_v19, 2 }
 0x1f2   :  { %v1385_v15 = vadd.f32 %v1384_v37, %v1383_v61  ;;  %1954 = vlog2.f32 %v1943_v48  ;;  %v1560_v58 = vsub.f32 1.0, %v1943_v48  ;;  %v1562_v26 = vsub.f32 1.0, %v1945_v53 }
 0x1f3   :  { %v1378_v43 = vadd.f32 %v1377_v21, %v1376_v5  ;;  %v1403_v7 = vadd.f32 %v1402_v28, %v1401_v56  ;;  %1956 = vlog2.f32 %v1945_v53  ;;  %v1396_v8 = vadd.f32 %v1395_v3, %v1394_v19 }
 0x1f4   :  { %v1386_v29 = vrot.slane %v1385_v15, 2  ;;  %1958 = vlog2.f32 %v1560_v58  ;;  %v1482_v16 = vcombine.low %v1939_v10, %v1943_v48  ;;  %v1483_v17 = vcombine.low %v1941_v0, %v1945_v53 }
 0x1f5   :  { %v1379_v32 = vrot.slane %v1378_v43, 1  ;;  %v1404_v38 = vrot.slane %v1403_v7, 2  ;;  %1960 = vlog2.f32 %v1562_v26  ;;  %v1397_v27 = vrot.slane %v1396_v8, 1 }
 0x1f6   :  { %v1387_v46 = vadd.f32 %v1386_v29, %v1385_v15  ;;  %v1492_v2 = vrot.slane %v1482_v16, %v3083_v14  ;;  %v1499_v12 = vrot.slane %v1483_v17, %v3083_v14 }
 0x1f7   :  { %v1380_v31 = vadd.f32 %v1379_v32, %v1378_v43  ;;  %v1405_v36 = vadd.f32 %v1404_v38, %v1403_v7  ;;  %v1947_v23 = vpop.eup %1946  ;;  %v1398_v4 = vadd.f32 %v1397_v27, %v1396_v8 }
 0x1f8   :  { %v1388_v39 = vrot.slane %v1387_v46, 1  ;;  %v1949_v54 = vpop.eup %1948  ;;  %v1536_v44 = vmul.f32 0.6931472, %v1947_v23  ;;  %v1514_v50 = vcombine.low %v1492_v2, %v1499_v12 }
 0x1f9   :  { %v1422_v49 = vadd.f32 %v3041_v45, %v1380_v31  ;;  %v1406_v57 = vrot.slane %v1405_v36, 1  ;;  %v1424_v25 = vadd.f32 %v3041_v45, %v1398_v4  ;;  %v1540_v6 = vmul.f32 0.6931472, %v1949_v54 }
 0x1fa   :  { %v1951_v51 = vpop.eup %1950  ;;  %v1389_v24 = vadd.f32 %v1388_v39, %v1387_v46  ;;  %v1551_v9 = vmax.f32 %v1536_v44, -100.0 }
 0x1fb   :  { %v1953_v40 = vpop.eup %1952  ;;  %v1430_v42 = vsub.f32 0.0, %v1422_v49  ;;  %v1407_v30 = vadd.f32 %v1406_v57, %v1405_v36  ;;  %v1568_v63 = vmul.f32 0.6931472, %v1951_v51  ;;  %v1432_v35 = vsub.f32 0.0, %v1424_v25 }
 0x1fc   :  { %v1955_v22 = vpop.eup %1954  ;;  %v1423_v55 = vadd.f32 %v3041_v45, %v1389_v24  ;;  %v1553_v60 = vmax.f32 %v1540_v6, -100.0  ;;  %v1572_v47 = vmul.f32 0.6931472, %v1953_v40 }
 0x1fd   :  { %v1957_v11 = vpop.eup %1956  ;;  %v1442_v33 = vmul.f32 1.442695, %v1430_v42  ;;  %v1425_v10 = vadd.f32 %v3041_v45, %v1407_v30  ;;  %v1538_v13 = vmul.f32 0.6931472, %v1955_v22  ;;  %v1583_v20 = vmax.f32 %v1568_v63, -100.0 }
 0x1fe   :  { %v1959_v41 = vpop.eup %1958  ;;  %v1446_v0 = vmul.f32 1.442695, %v1432_v35  ;;  %v1431_v34 = vsub.f32 0.0, %v1423_v55  ;;  %v1542_v61 = vmul.f32 0.6931472, %v1957_v11  ;;  %v1585_v59 = vmax.f32 %v1572_v47, -100.0 }
 0x1ff   :  { %v1961_v5 = vpop.eup %1960  ;;  %1962 = vpow2.f32 %v1442_v33  ;;  %v1433_v56 = vsub.f32 0.0, %v1425_v10  ;;  %v1552_v1 = vmax.f32 %v1538_v13, -100.0  ;;  %v1570_v19 = vmul.f32 0.6931472, %v1959_v41 }
 0x200   :  { %1964 = vpow2.f32 %v1446_v0  ;;  %v1444_v37 = vmul.f32 1.442695, %v1431_v34  ;;  %v1554_v48 = vmax.f32 %v1542_v61, -100.0  ;;  %v1574_v52 = vmul.f32 0.6931472, %v1961_v5 }
 0x201   :  { %v1448_v21 = vmul.f32 1.442695, %v1433_v56  ;;  %v1584_v28 = vmax.f32 %v1570_v19, -100.0  ;;  %v1599_v53 = vcombine.low %v1551_v9, %v1552_v1  ;;  %v1522_v45 = vrot.slane %v1514_v50, %v3083_v14  ;;  %v46_v19 = vld [vmem:[%s3156_s2] sm:$0xff]  ;;  %s2049_s2 = smov [#allocation5]  }
 0x202   :  { %1966 = vpow2.f32 %v1444_v37  ;;  %v1586_v3 = vmax.f32 %v1574_v52, -100.0  ;;  %v1600_v15 = vcombine.low %v1553_v60, %v1554_v48  ;;  %s1840_s11 = sshll.u32 %s2049_s2, 4  ;;  %s1841_s11 = int_to_ptr.vmem [resolvable:$true] %s1840_s11 }
 0x203   :  { %1968 = vpow2.f32 %v1448_v21  ;;  %v1609_v58 = vrot.slane %v1599_v53, %v3083_v14  ;;  %v1659_v43 = vcombine.low %v1583_v20, %v1584_v28  ;;  %s1994_s12 = scalar_lea.vmem %s1841_s11, 128  ;;  %p1999_p1 = scmp.lt.s32.totalorder %s1841_s11, %s1841_s11 }
 0x204   :  { %v1616_v7 = vrot.slane %v1600_v15, %v3083_v14  ;;  %v1660_v26 = vcombine.low %v1585_v59, %v1586_v3  ;;  %v1533_v3 = vadd.f32 1.0, %v46_v19  ;;  %p1995_p0 = scmp.ne.s32.totalorder %s1841_s11, %s1994_s12  ;;  %p2000_p2 = scmp.lt.s32.totalorder %s1994_s12, %s1994_s12 }
 0x205   :  { %v1669_v8 = vrot.slane %v1659_v43, %v3083_v14 }
 0x206   :  { %v3095_v29 = vcombine.low %v1609_v58, %v1616_v7  ;;  %v1676_v16 = vrot.slane %v1660_v26, %v3083_v14  ;;  %p2001_p3 = por %p2000_p2, %p1999_p1 }
 0x208   :  { %v1639_v32 = vrot.slane %v3095_v29, %v3083_v14  ;;  %v3100_v38 = vcombine.low %v1669_v8, %v1676_v16  ;;  %v3309_v29 = vld [vmem:[#allocation11_spill] sm:$0xff]  ;;  %p2002_p4 = pnand %p2001_p3, %p1995_p0 }
 0x209   :  { %v1963_v17 = vpop.eup %1962 }
 0x20a   :  { %v1965_v27 = vpop.eup %1964  ;;  %v1454_v46 = vadd.f32 1.0, %v1963_v17  ;;  %v1699_v2 = vrot.slane %v3100_v38, %v3083_v14  ;;  %v1534_v17 = vmul.f32 0.5, %v1533_v3 }
 0x20b   :  { %v1456_v31 = vadd.f32 1.0, %v1965_v27 }
 0x20c   :  { %v1967_v36 = vpop.eup %1966  ;;  %1970 = vrcp.f32 %v1454_v46 }
 0x20d   :  { %v1969_v12 = vpop.eup %1968  ;;  %1972 = vrcp.f32 %v1456_v31  ;;  %v1455_v23 = vadd.f32 1.0, %v1967_v36 }
 0x20e   :  { %v1457_v4 = vadd.f32 1.0, %v1969_v12  ;;  %v1650_v12 = vsub.f32 1.0, %v1534_v17 }
 0x20f   :  { %1974 = vrcp.f32 %v1455_v23 }
 0x210   :  { %1976 = vrcp.f32 %v1457_v4 }
 0x216   :  { %v1971_v39 = vpop.eup %1970 }
 0x217   :  { %v1973_v54 = vpop.eup %1972  ;;  %1978 = vlog2.f32 %v1971_v39  ;;  %v1563_v49 = vsub.f32 1.0, %v1971_v39 }
 0x218   :  { %1980 = vlog2.f32 %v1973_v54  ;;  %v1565_v44 = vsub.f32 1.0, %v1973_v54 }
 0x219   :  { %v1975_v57 = vpop.eup %1974  ;;  %1982 = vlog2.f32 %v1563_v49 }
 0x21a   :  { %v1977_v50 = vpop.eup %1976  ;;  %1984 = vlog2.f32 %v1975_v57  ;;  %v1564_v51 = vsub.f32 1.0, %v1975_v57  ;;  %v1484_v25 = vcombine.low %v1971_v39, %v1975_v57 }
 0x21b   :  { %1986 = vlog2.f32 %v1977_v50  ;;  %v1566_v24 = vsub.f32 1.0, %v1977_v50  ;;  %v1485_v6 = vcombine.low %v1973_v54, %v1977_v50  ;;  %v3307_v50 = vld [vmem:[#allocation10_spill] sm:$0xff] }
 0x21c   :  { %1988 = vlog2.f32 %v1564_v51  ;;  %v1506_v40 = vrot.slane %v1484_v25, %v3083_v14  ;;  %v3308_v25 = vld [vmem:[#allocation13_spill] sm:$0xff] }
 0x21d   :  { %1990 = vlog2.f32 %v1565_v44  ;;  %v1513_v42 = vrot.slane %v1485_v6, %v3083_v14 }
 0x21e   :  { %1992 = vlog2.f32 %v1566_v24 }
 0x21f   :  { %v1515_v30 = vcombine.low %v1506_v40, %v1513_v42 }
 0x221   :  { %v1979_v9 = vpop.eup %1978  ;;  %v1529_v63 = vrot.slane %v1515_v30, %v3083_v14 }
 0x222   :  { %v1981_v22 = vpop.eup %1980  ;;  %v1544_v35 = vmul.f32 0.6931472, %v1979_v9 }
 0x223   :  { %v1983_v55 = vpop.eup %1982  ;;  %v1548_v60 = vmul.f32 0.6931472, %v1981_v22  ;;  %v1530_v47 = vcombine.low %v1522_v45, %v1529_v63 }
 0x224   :  { %v1985_v11 = vpop.eup %1984  ;;  %v1576_v33 = vmul.f32 0.6931472, %v1983_v55  ;;  %v1555_v20 = vmax.f32 %v1544_v35, -100.0 }
 0x225   :  { %v1987_v10 = vpop.eup %1986  ;;  %v1546_v13 = vmul.f32 0.6931472, %v1985_v11  ;;  %1532 = vst [vmem:[#allocation5] sm:$0xff] %v1530_v47  ;;  %v1557_v34 = vmax.f32 %v1548_v60, -100.0 }
 0x226   :  { %v1989_v41 = vpop.eup %1988  ;;  %v1550_v0 = vmul.f32 0.6931472, %v1987_v10  ;;  %v1587_v56 = vmax.f32 %v1576_v33, -100.0 }
 0x227   :  { %v1991_v61 = vpop.eup %1990  ;;  %v1556_v59 = vmax.f32 %v1546_v13, -100.0  ;;  %v1578_v5 = vmul.f32 0.6931472, %v1989_v41 }
 0x228   :  { %v1993_v1 = vpop.eup %1992  ;;  %v1558_v37 = vmax.f32 %v1550_v0, -100.0  ;;  %v1580_v48 = vmul.f32 0.6931472, %v1991_v61 }
 0x229   :  { %v1582_v52 = vmul.f32 0.6931472, %v1993_v1  ;;  %v1588_v21 = vmax.f32 %v1578_v5, -100.0  ;;  %v1601_v28 = vcombine.low %v1555_v20, %v1556_v59 }
 0x22a   :  { %v1589_v53 = vmax.f32 %v1580_v48, -100.0  ;;  %v1602_v45 = vcombine.low %v1557_v34, %v1558_v37 }
 0x22b   :  { %v1590_v15 = vmax.f32 %v1582_v52, -100.0  ;;  %v1623_v58 = vrot.slane %v1601_v28, %v3083_v14  ;;  %v1661_v43 = vcombine.low %v1587_v56, %v1588_v21 }
 0x22c   :  { %v1630_v7 = vrot.slane %v1602_v45, %v3083_v14 }
 0x22d   :  { %v1662_v26 = vcombine.low %v1589_v53, %v1590_v15  ;;  %v1683_v8 = vrot.slane %v1661_v43, %v3083_v14 }
 0x22e   :  { %v1632_v16 = vcombine.low %v1623_v58, %v1630_v7 }
 0x22f   :  { %v1690_v27 = vrot.slane %v1662_v26, %v3083_v14 }
 0x230   :  { %v1646_v46 = vrot.slane %v1632_v16, %v3083_v14 }
 0x231   :  { %v1692_v31 = vcombine.low %v1683_v8, %v1690_v27 }
 0x232   :  { %v1647_v36 = vcombine.low %v1639_v32, %v1646_v46 }
 0x233   :  { %v1706_v23 = vrot.slane %v1692_v31, %v3083_v14 }
 0x234   :  { %v1649_v39 = vmul.f32 %v1647_v36, %v1534_v17 }
 0x235   :  { %v1707_v4 = vcombine.low %v1699_v2, %v1706_v23 }
 0x237   :  { %v1709_v54 = vmul.f32 %v1707_v4, %v1650_v12 }
 0x239   :  { %v1710_v49 = vadd.f32 %v1709_v54, %v1649_v39 }
 0x23b   :  { %v1711_v57 = vsub.f32 0.0, %v1710_v49 }
 0x23d   :  { %v1744_v44 = vrot.slane %v1711_v57, %v3305_v18  ;;  %v1748_v51 = vrot.slane %v1711_v57, %v3307_v50  ;;  %v1752_v24 = vrot.slane %v1711_v57, %v3308_v25  ;;  %v1756_v32 = vrot.slane %v1711_v57, %v3309_v29 }
 0x23f   :  { %v1790_v6 = vsel %vm1789_vm2, %v1744_v44, 0.0  ;;  %v1791_v40 = vsel %vm1789_vm2, %v1748_v51, 0.0  ;;  %v1793_v30 = vsel %vm1789_vm2, %v1752_v24, 0.0  ;;  %v1795_v14 = vsel %vm1789_vm2, %v1756_v32, 0.0 }
 0x240   :  { %v1792_v42 = vadd.f32 %v1791_v40, %v1790_v6 }
 0x242   :  { %v1794_v9 = vadd.f32 %v1793_v30, %v1792_v42 }
 0x244   :  { %v1796_v38 = vadd.f32 %v1795_v14, %v1794_v9 }
 0x246   :  { %1805 = vadd.xlane.f32.xlu0 %v1796_v38 }
 0x247   :  { %2005 = shalt.err (!%p2002_p4)
}
 0x248   :  { %s2006_s15 = scalar_lea.hbm %s3164_s10, 128 }
 0x249   :  { %p2007_p5 = scmp.ne.s32.totalorder %s3164_s10, %s2006_s15  ;;  %p2010_p6 = scmp.lt.u32.totalorder %s2006_s15, %s3164_s10 }
 0x24b   :  { %p2012_p7 = pnand %p2010_p6, %p2007_p5 }
 0x24d   :  { %2015 = shalt.err (!%p2012_p7)
}
 0x24e   :  { %1843 = dma.vmem_to_hbm [thread:$0]  %s1841_s11, 128, %s3164_s10, [#allocation6]   ;;  %v1739_v60 = vld [vmem:[#allocation3] sm:$0x1] }
 0x24f   :  { %s2050_s3 = smov [#allocation3]  }
 0x250   :  { %s1830_s22 = sshll.u32 %s2050_s3, 4  ;;  %s1831_s22 = int_to_ptr.vmem [resolvable:$true] %s1830_s22 }
 0x251   :  { %s2016_s10 = scalar_lea.vmem %s1831_s22, 16  ;;  %s2020_s4 = scalar_lea.vmem %s1831_s22, 32 }
 0x252   :  { %p2017_p8 = scmp.ne.s32.totalorder %s1831_s22, %s2016_s10  ;;  %p2021_p9 = scmp.lt.s32.totalorder %s1831_s22, %s1831_s22 }
 0x253   :  { %p2022_p10 = scmp.lt.s32.totalorder %s2020_s4, %s2016_s10 }
 0x255   :  { %p2023_p11 = por %p2022_p10, %p2021_p9 }
 0x257   :  { %p2024_p12 = pnand %p2023_p11, %p2017_p8 }
 0x2d3   :  { %v1806_v62 = vpop.xlane.xlu0 %1805 }
 0x2d4   :  { %v1807_v18 = vrot.slane %v1806_v62, 4 }
 0x2d6   :  { %v1808_v2 = vadd.f32 %v1807_v18, %v1806_v62 }
 0x2d8   :  { %v1809_v63 = vrot.slane %v1808_v2, 2 }
 0x2da   :  { %v1810_v22 = vadd.f32 %v1809_v63, %v1808_v2 }
 0x2dc   :  { %v1811_v35 = vrot.slane %v1810_v22, 1 }
 0x2de   :  { %v1812_v55 = vadd.f32 %v1811_v35, %v1810_v22 }
 0x2e0   :  { %1900 = vpush %v1812_v55 }
 0x311   :  { %s1901_s21 = spop %1900 }
 0x312   :  { %v1814_v47 = vstv %s1901_s21 }
 0x313   :  { %v1815_v11 = vadd.f32 %v1814_v47, %v1739_v60 }
 0x315   :  { %1817 = vst.msk [vmem:[#allocation3] sm:$0x1] %vm42_vm12, %v1815_v11 }
 0x31c   :  { %v1821_v33 = vld [vmem:[#allocation3] sm:$0x1] }
 0x31d   :  { %v1822_v10 = vmul.f32 0.001953125, %v1821_v33 }
 0x31f   :  { %1823 = vst.msk [vmem:[#allocation3] sm:$0x1] %vm42_vm12, %v1822_v10 }
 0x320   :  { %2027 = shalt.err (!%p2024_p12)
}
 0x321   :  { %s2028_s24 = scalar_lea.hbm %s3163_s9, 16 }
 0x322   :  { %p2029_p13 = scmp.ne.s32.totalorder %s3163_s9, %s2028_s24  ;;  %p2032_p0 = scmp.lt.u32.totalorder %s2028_s24, %s3163_s9 }
 0x324   :  { %p2034_p1 = pnand %p2032_p0, %p2029_p13 }
 0x326   :  { %2037 = shalt.err (!%p2034_p1)
}
 0x327   :  { %1833 = dma.vmem_to_hbm [thread:$0]  %s1831_s22, 16, %s3163_s9, [#allocation4]  }
 0x328   :  { %2038 = dma.done.wait [#allocation4], 16  }
 0x329   :  { %2039 = vsyncadd [#allocation4], 4294967280 }
 0x32a   :  { %2040 = dma.done.wait [#allocation6], 128  }
 0x32b   :  { %2041 = vsyncadd [#allocation6], 4294967168 }
 0x32c   :  { %1850 = vsyncpa [#allocation4], 1 }
 0x32d   :  { %1851 = vsyncpa [#allocation6], 1 }

</bundles_post_ra>
